<compile_context>
chip_gen: v7x
topology: tpu7x:2x2x1
jax: 0.10.0
libtpu: 0.0.40
codegen_flags: <defaults>
</compile_context>

<pallas_src>
import functools
import math

import jax
import jax.numpy as jnp
from jax.experimental import pallas as pl
from jax.experimental.pallas import tpu as pltpu

STORE_DTYPE = jnp.bfloat16   # HBM storage dtype (weights / inter-layer activations)
LN_EPS = 1e-12               # HF ViTConfig default layer_norm_eps

# 48 MiB leaves headroom on v7x (64 MiB physical per TensorCore); raise to
# ~96-112 MiB on v5e/v6e (128 MiB physical) when fusing larger configurations.
_VMEM_LIMIT = 48 * 1024 * 1024
_CP_GRID1 = pltpu.CompilerParams(dimension_semantics=("parallel",),
                                 vmem_limit_bytes=_VMEM_LIMIT)
_CP_GRID2 = pltpu.CompilerParams(dimension_semantics=("parallel", "parallel"),
                                 vmem_limit_bytes=_VMEM_LIMIT)
_CP_NOGRID = pltpu.CompilerParams(vmem_limit_bytes=_VMEM_LIMIT)

_VMEM_FULL = functools.partial(pl.BlockSpec, memory_space=pltpu.MemorySpace.VMEM)


# ----------------------------------------------------------------------------
# In-kernel helpers (traced inside Pallas bodies, always in f32)
# ----------------------------------------------------------------------------

def _layernorm_f32(x, g, b, eps):
    mu = jnp.mean(x, axis=-1, keepdims=True)
    var = jnp.mean((x - mu) ** 2, axis=-1, keepdims=True)
    return (x - mu) * jax.lax.rsqrt(var + eps) * g + b


# ----------------------------------------------------------------------------
# Generic tiled linear (used for the patch-embedding matmul)
# ----------------------------------------------------------------------------

def _linear_kernel(x_ref, w_ref, b_ref, o_ref):
    y = jnp.dot(x_ref[...], w_ref[...], preferred_element_type=jnp.float32)
    y = y + b_ref[...]
    o_ref[...] = y.astype(o_ref.dtype)


def _pick_tile(dim, candidates=(512, 256, 128)):
    for c in candidates:
        if dim % c == 0:
            return c
    return dim  # fall back to the full dimension (small demo shapes)


def linear(x, w, b, out_dtype=STORE_DTYPE):
    """(M,K) @ (K,N) + b, M/N tiled; M is the fastest grid axis so the (K,tn)
    weight tile is the slowly varying block (its DMA is skipped between
    consecutive steps)."""
    M, K = x.shape
    N = w.shape[1]
    tm, tn = _pick_tile(M), _pick_tile(N)
    return pl.pallas_call(
        _linear_kernel,
        out_shape=jax.ShapeDtypeStruct((M, N), out_dtype),
        grid=(N // tn, M // tm),
        in_specs=[
            pl.BlockSpec((tm, K), lambda n, m: (m, 0)),
            pl.BlockSpec((K, tn), lambda n, m: (0, n)),
            pl.BlockSpec((1, tn), lambda n, m: (0, n)),
        ],
        out_specs=pl.BlockSpec((tm, tn), lambda n, m: (m, n)),
        compiler_params=_CP_GRID2,
    )(x, w, b.reshape(1, N))


# ----------------------------------------------------------------------------
# Fully fused transformer layer (attention sub-layer + FFN sub-layer, pre-LN)
#   y = x'; x' = x + Wo(Attn(LN1(x)));  y = x' + W2(GELU(W1(LN2(x'))))
# ----------------------------------------------------------------------------

def _transformer_layer_kernel(x_ref, ln1_g_ref, ln1_b_ref, wqkv_ref, bqkv_ref,
                              wo_ref, bo_ref, ln2_g_ref, ln2_b_ref,
                              w1_ref, b1_ref, w2_ref, b2_ref, o_ref,
                              *, n_heads, eps):
    Bt, S, H = x_ref.shape
    Dh = H // n_heads

    # Residual stream in f32, flattened to (Bt*S, H) so the big projection
    # matmuls see a larger MXU M dimension.
    x = x_ref[...].astype(jnp.float32).reshape(Bt * S, H)

    # ---- Attention sub-layer: x + Wo(Attn(LN1(x))) ---------------------------
    h = _layernorm_f32(x, ln1_g_ref[...], ln1_b_ref[...], eps)
    qkv = jnp.dot(h.astype(wqkv_ref.dtype), wqkv_ref[...],
                  preferred_element_type=jnp.float32) + bqkv_ref[...]   # (Bt*S, 3H)
    qkv = qkv.reshape(Bt, S, 3 * H)

    # Per-head attention.  The output projection is accumulated head by head
    # (ctx_h @ Wo[hDh:(h+1)Dh, :]) -> no (S,H) concatenate / misaligned column
    # writes.  The 1/sqrt(Dh) scale is pre-folded into the Q weights.
    attn = jnp.zeros((Bt * S, H), jnp.float32)
    for hi in range(n_heads):
        qh = qkv[:, :, hi * Dh:(hi + 1) * Dh]
        kh = qkv[:, :, H + hi * Dh:H + (hi + 1) * Dh]
        vh = qkv[:, :, 2 * H + hi * Dh:2 * H + (hi + 1) * Dh]
        s = jnp.einsum("bqd,bkd->bqk", qh, kh,
                       preferred_element_type=jnp.float32)              # (Bt,S,S)
        m = jnp.max(s, axis=-1, keepdims=True)
        p = jnp.exp(s - m)
        denom = jnp.sum(p, axis=-1, keepdims=True)
        p = p * pl.reciprocal(denom, approx=True)                        # EUP slot
        ctx = jnp.einsum("bqk,bkd->bqd", p, vh,
                         preferred_element_type=jnp.float32)             # (Bt,S,Dh)
        attn = attn + jnp.dot(ctx.reshape(Bt * S, Dh).astype(wo_ref.dtype),
                              wo_ref[hi * Dh:(hi + 1) * Dh, :],
                              preferred_element_type=jnp.float32)
    x = x + attn + bo_ref[...]                                           # residual

    # ---- FFN sub-layer: x + W2(GELU(W1(LN2(x)))) -----------------------------
    h2 = _layernorm_f32(x, ln2_g_ref[...], ln2_b_ref[...], eps)
    f = jnp.dot(h2.astype(w1_ref.dtype), w1_ref[...],
                preferred_element_type=jnp.float32) + b1_ref[...]
    # TODO(synk): HF ViT uses erf-GELU; tanh-approx GELU used here.
    f = jax.nn.gelu(f, approximate=True)
    out = jnp.dot(f.astype(w2_ref.dtype), w2_ref[...],
                  preferred_element_type=jnp.float32) + b2_ref[...]
    y = x + out                                                          # residual

    o_ref[...] = y.reshape(Bt, S, H).astype(o_ref.dtype)


def _pick_batch_block(B):
    # Bt>1 fills the MXU M-dim on the projection matmuls; keep >= 2 grid steps
    # so both v7x TensorCores get work.
    for bt in (4, 2, 1):
        if B % bt == 0 and B // bt >= 2:
            return bt
    return B


def transformer_layer(x, lp, n_heads, eps=LN_EPS):
    B, S, H = x.shape
    F = lp["w1"].shape[1]
    Bt = _pick_batch_block(B)

    def rep(arr):
        # Whole-array block, constant across the batch grid axis.  Single-
        # buffered: the block never changes, so double-buffering only wastes
        # VMEM (critical for deeper fusion on v7x's 64 MiB VMEM).
        nd = arr.ndim
        return pl.BlockSpec(arr.shape, lambda b: (0,) * nd,
                            pipeline_mode=pl.Buffered(buffer_count=1))

    seq_spec = pl.BlockSpec((Bt, S, H), lambda b: (b, 0, 0))
    ln1_g = lp["ln1_g"].reshape(1, H)
    ln1_b = lp["ln1_b"].reshape(1, H)
    bqkv = lp["bqkv"].reshape(1, 3 * H)
    bo = lp["bo"].reshape(1, H)
    ln2_g = lp["ln2_g"].reshape(1, H)
    ln2_b = lp["ln2_b"].reshape(1, H)
    b1 = lp["b1"].reshape(1, F)
    b2 = lp["b2"].reshape(1, H)

    weights = (ln1_g, ln1_b, lp["wqkv"], bqkv, lp["wo"], bo,
               ln2_g, ln2_b, lp["w1"], b1, lp["w2"], b2)

    return pl.pallas_call(
        functools.partial(_transformer_layer_kernel, n_heads=n_heads, eps=eps),
        out_shape=jax.ShapeDtypeStruct((B, S, H), x.dtype),
        grid=(B // Bt,),
        in_specs=[seq_spec] + [rep(a) for a in weights],
        out_specs=seq_spec,
        compiler_params=_CP_GRID1,
    )(x, *weights)


# ----------------------------------------------------------------------------
# Fused head: final LN (on the CLS row) + pooler dense+tanh + classifier
# Classifier weight is pre-padded to a 128-lane multiple -> unmasked stores.
# ----------------------------------------------------------------------------

def _head_kernel(cls_ref, g_ref, b_ref, pw_ref, pb_ref, cw_ref, cb_ref, o_ref,
                 *, eps):
    x = cls_ref[...].astype(jnp.float32)             # (B, H)
    h = _layernorm_f32(x, g_ref[...], b_ref[...], eps)
    pooled = jnp.tanh(jnp.dot(h.astype(pw_ref.dtype), pw_ref[...],
                              preferred_element_type=jnp.float32) + pb_ref[...])
    logits = jnp.dot(pooled.astype(cw_ref.dtype), cw_ref[...],
                     preferred_element_type=jnp.float32) + cb_ref[...]
    o_ref[...] = logits


def head(cls_emb, params, eps=LN_EPS):
    B, H = cls_emb.shape
    n_pad = params["cls_w"].shape[1]
    return pl.pallas_call(
        functools.partial(_head_kernel, eps=eps),
        out_shape=jax.ShapeDtypeStruct((B, n_pad), jnp.float32),
        in_specs=[_VMEM_FULL()] * 7,
        out_specs=_VMEM_FULL(),
        compiler_params=_CP_NOGRID,
    )(cls_emb,
      params["final_ln_g"].reshape(1, H), params["final_ln_b"].reshape(1, H),
      params["pool_w"], params["pool_b"].reshape(1, H),
      params["cls_w"], params["cls_b"].reshape(1, n_pad))


# ----------------------------------------------------------------------------
# Forward pass (matches VitClassifier: ViTModel pooler_output -> Linear)
# ----------------------------------------------------------------------------

def vit_classifier_forward(params, image_tensor, cfg):
    H, nH, P = cfg["hidden"], cfg["heads"], cfg["patch"]
    B, C, Himg, Wimg = image_tensor.shape
    nph, npw = Himg // P, Wimg // P
    npatch = nph * npw

    # Patch-embedding conv (kernel=stride=P) == matmul over (C,ph,pw)-flattened
    # patches, exactly like nn.Conv2d's weight layout.  Extraction is glue.
    patches = (image_tensor
               .reshape(B, C, nph, P, npw, P)
               .transpose(0, 2, 4, 1, 3, 5)
               .reshape(B * npatch, C * P * P)).astype(STORE_DTYPE)
    pe = linear(patches, params["patch_w"], params["patch_b"]).reshape(B, npatch, H)

    cls_tok = jnp.broadcast_to(params["cls"].reshape(1, 1, H), (B, 1, H))
    x = jnp.concatenate([cls_tok, pe], axis=1) + params["pos_emb"][None]   # (B,S,H)

    for lp in params["layers"]:
        x = transformer_layer(x, lp, nH)        # one fused kernel per layer

    cls_emb = x[:, 0, :]                        # (B, H) — only CLS feeds the head
    logits_pad = head(cls_emb, params)          # final LN + pooler + classifier
    return logits_pad[:, :cfg["num_classes"]]


# ----------------------------------------------------------------------------
# Deterministic synthetic parameter init (no checkpoint loading)
# ----------------------------------------------------------------------------

def _dense(key, fan_in, fan_out, scale=0.02):
    w = (scale * jax.random.normal(key, (fan_in, fan_out), jnp.float32)
         ).astype(STORE_DTYPE)
    b = jnp.zeros((fan_out,), jnp.float32)
    return w, b


def _layer_init(key, H, F, n_heads):
    Dh = H // n_heads
    ks = jax.random.split(key, 4)
    wqkv = 0.02 * jax.random.normal(ks[0], (H, 3 * H), jnp.float32)
    # Fold the 1/sqrt(Dh) attention scale into the Q projection (zero runtime
    # cost).  Note: it would apply to bqkv[:H] too, which is zero-init here.
    wqkv = wqkv.at[:, :H].multiply(1.0 / math.sqrt(Dh))
    bqkv = jnp.zeros((3 * H,), jnp.float32)
    wo, bo = _dense(ks[1], H, H)
    w1, b1 = _dense(ks[2], H, F)
    w2, b2 = _dense(ks[3], F, H)
    ones = jnp.ones((H,), jnp.float32)
    zeros = jnp.zeros((H,), jnp.float32)
    return dict(wqkv=wqkv.astype(STORE_DTYPE), bqkv=bqkv, wo=wo, bo=bo,
                w1=w1, b1=b1, w2=w2, b2=b2,
                ln1_g=ones, ln1_b=zeros, ln2_g=ones, ln2_b=zeros)


def init_params(key, cfg):
    H, F, P, C = cfg["hidden"], cfg["ffn"], cfg["patch"], cfg["channels"]
    npatch = (cfg["img"] // P) ** 2
    ks = jax.random.split(key, 7)
    ones = jnp.ones((H,), jnp.float32)
    zeros = jnp.zeros((H,), jnp.float32)

    patch_w, patch_b = _dense(ks[0], C * P * P, H)
    pool_w, pool_b = _dense(ks[1], H, H)

    n_cls = cfg["num_classes"]
    n_pad = ((n_cls + 127) // 128) * 128                    # lane-dense classifier
    cls_w_full = 0.02 * jax.random.normal(ks[2], (H, n_cls), jnp.float32)
    cls_w = (jnp.zeros((H, n_pad), jnp.float32)
             .at[:, :n_cls].set(cls_w_full)).astype(STORE_DTYPE)
    cls_b = jnp.zeros((n_pad,), jnp.float32)

    return dict(
        patch_w=patch_w, patch_b=patch_b,
        cls=(0.02 * jax.random.normal(ks[3], (1, H), jnp.float32)
             ).astype(STORE_DTYPE),
        pos_emb=(0.02 * jax.random.normal(ks[4], (npatch + 1, H), jnp.float32)
                 ).astype(STORE_DTYPE),
        layers=[_layer_init(k, H, F, cfg["heads"])
                for k in jax.random.split(ks[5], cfg["layers"])],
        final_ln_g=ones, final_ln_b=zeros,
        pool_w=pool_w, pool_b=pool_b,
        cls_w=cls_w, cls_b=cls_b,
    )


# ----------------------------------------------------------------------------
# Demo
# ----------------------------------------------------------------------------

if __name__ == "__main__":
    CFG = dict(hidden=32, heads=4, ffn=64, num_classes=3,
               channels=3, img=32, patch=8, layers=2)

    key = jax.random.PRNGKey(0)
    k_param, k_img = jax.random.split(key)

    params = init_params(k_param, CFG)

    B = 2
    image_tensor = jax.random.normal(
        k_img, (B, CFG["channels"], CFG["img"], CFG["img"]), jnp.float32)

    fwd = jax.jit(lambda p, img: vit_classifier_forward(p, img, CFG))
    logits = fwd(params, image_tensor)
    jax.block_until_ready(logits)
    assert logits.shape == (B, CFG["num_classes"])
    print("KERNEL_OK")
</pallas_src>

<mosaic_0001>
module attributes {stable_mosaic.version = 11 : i64} {
  func.func @_linear_kernel(%arg0: i32, %arg1: i32, %arg2: memref<32x192xbf16, #tpu.memory_space<vmem>>, %arg3: memref<192x32xbf16, #tpu.memory_space<vmem>>, %arg4: memref<1x32xf32, #tpu.memory_space<vmem>>, %arg5: memref<32x32xbf16, #tpu.memory_space<vmem>>) attributes {dimension_semantics = [#tpu.dimension_semantics<parallel>, #tpu.dimension_semantics<parallel>], iteration_bounds = array<i64: 1, 1>, scalar_prefetch = 0 : i64, scratch_operands = 0 : i64, tpu.core_type = #tpu.core_type<tc>, window_params = [{transform_indices = @transform_0, window_bounds = array<i64: 32, 192>}, {transform_indices = @transform_1, window_bounds = array<i64: 192, 32>}, {transform_indices = @transform_2, window_bounds = array<i64: 1, 32>}, {transform_indices = @transform_3, window_bounds = array<i64: 32, 32>}]} {
    %c0 = arith.constant 0 : index
    %c0_0 = arith.constant 0 : index
    %0 = vector.load %arg2[%c0, %c0_0] : memref<32x192xbf16, #tpu.memory_space<vmem>>, vector<32x192xbf16>
    %c0_1 = arith.constant 0 : index
    %c0_2 = arith.constant 0 : index
    %1 = vector.load %arg3[%c0_1, %c0_2] : memref<192x32xbf16, #tpu.memory_space<vmem>>, vector<192x32xbf16>
    %cst = arith.constant dense<0.000000e+00> : vector<32x32xf32>
    %2 = tpu.matmul %0, %1, %cst {dimension_numbers = #tpu.dot_dimension_numbers<[1], [0], [0], [1], [0, 0, 1, 1], [], []>} : vector<32x192xbf16>, vector<192x32xbf16>, vector<32x32xf32> -> vector<32x32xf32>
    %c0_3 = arith.constant 0 : index
    %c0_4 = arith.constant 0 : index
    %3 = vector.load %arg4[%c0_3, %c0_4] : memref<1x32xf32, #tpu.memory_space<vmem>>, vector<1x32xf32>
    %4 = vector.broadcast %3 : vector<1x32xf32> to vector<32x32xf32>
    %5 = arith.addf %2, %4 : vector<32x32xf32>
    %6 = arith.truncf %5 : vector<32x32xf32> to vector<32x32xbf16>
    %c0_5 = arith.constant 0 : index
    %c0_6 = arith.constant 0 : index
    %7 = vector.load %arg5[%c0_5, %c0_6] : memref<32x32xbf16, #tpu.memory_space<vmem>>, vector<32x32xbf16>
    tpu.vector_store %arg5[%c0_5, %c0_6], %6 {strides = array<i32>} : memref<32x32xbf16, #tpu.memory_space<vmem>>, vector<32x32xbf16>,
    return
  }
  func.func @transform_0(%arg0: i32, %arg1: i32) -> (i32, i32) {
    %c0_i32 = arith.constant 0 : i32
    %c0_i32_0 = arith.constant 0 : i32
    return %arg1, %c0_i32 : i32, i32
  }
  func.func @transform_1(%arg0: i32, %arg1: i32) -> (i32, i32) {
    %c0_i32 = arith.constant 0 : i32
    %c0_i32_0 = arith.constant 0 : i32
    return %c0_i32, %arg0 : i32, i32
  }
  func.func @transform_2(%arg0: i32, %arg1: i32) -> (i32, i32) {
    %c0_i32 = arith.constant 0 : i32
    %c0_i32_0 = arith.constant 0 : i32
    return %c0_i32, %arg0 : i32, i32
  }
  func.func @transform_3(%arg0: i32, %arg1: i32) -> (i32, i32) {
    %c0_i32 = arith.constant 0 : i32
    return %arg1, %arg0 : i32, i32
  }
}

module attributes {stable_mosaic.version = 11 : i64} {
  func.func @_transformer_layer_kernel(%arg0: i32, %arg1: memref<1x17x32xbf16, #tpu.memory_space<vmem>>, %arg2: memref<1x32xf32, #tpu.memory_space<vmem>>, %arg3: memref<1x32xf32, #tpu.memory_space<vmem>>, %arg4: memref<32x96xbf16, #tpu.memory_space<vmem>>, %arg5: memref<1x96xf32, #tpu.memory_space<vmem>>, %arg6: memref<32x32xbf16, #tpu.memory_space<vmem>>, %arg7: memref<1x32xf32, #tpu.memory_space<vmem>>, %arg8: memref<1x32xf32, #tpu.memory_space<vmem>>, %arg9: memref<1x32xf32, #tpu.memory_space<vmem>>, %arg10: memref<32x64xbf16, #tpu.memory_space<vmem>>, %arg11: memref<1x64xf32, #tpu.memory_space<vmem>>, %arg12: memref<64x32xbf16, #tpu.memory_space<vmem>>, %arg13: memref<1x32xf32, #tpu.memory_space<vmem>>, %arg14: memref<1x17x32xbf16, #tpu.memory_space<vmem>>) attributes {dimension_semantics = [#tpu.dimension_semantics<parallel>], iteration_bounds = array<i64: 2>, scalar_prefetch = 0 : i64, scratch_operands = 0 : i64, tpu.core_type = #tpu.core_type<tc>, window_params = [{transform_indices = @transform_0, window_bounds = array<i64: 1, 17, 32>}, {pipeline_mode = #tpu.pipeline_mode<synchronous>, transform_indices = @transform_1, window_bounds = array<i64: 1, 32>}, {pipeline_mode = #tpu.pipeline_mode<synchronous>, transform_indices = @transform_2, window_bounds = array<i64: 1, 32>}, {pipeline_mode = #tpu.pipeline_mode<synchronous>, transform_indices = @transform_3, window_bounds = array<i64: 32, 96>}, {pipeline_mode = #tpu.pipeline_mode<synchronous>, transform_indices = @transform_4, window_bounds = array<i64: 1, 96>}, {pipeline_mode = #tpu.pipeline_mode<synchronous>, transform_indices = @transform_5, window_bounds = array<i64: 32, 32>}, {pipeline_mode = #tpu.pipeline_mode<synchronous>, transform_indices = @transform_6, window_bounds = array<i64: 1, 32>}, {pipeline_mode = #tpu.pipeline_mode<synchronous>, transform_indices = @transform_7, window_bounds = array<i64: 1, 32>}, {pipeline_mode = #tpu.pipeline_mode<synchronous>, transform_indices = @transform_8, window_bounds = array<i64: 1, 32>}, {pipeline_mode = #tpu.pipeline_mode<synchronous>, transform_indices = @transform_9, window_bounds = array<i64: 32, 64>}, {pipeline_mode = #tpu.pipeline_mode<synchronous>, transform_indices = @transform_10, window_bounds = array<i64: 1, 64>}, {pipeline_mode = #tpu.pipeline_mode<synchronous>, transform_indices = @transform_11, window_bounds = array<i64: 64, 32>}, {pipeline_mode = #tpu.pipeline_mode<synchronous>, transform_indices = @transform_12, window_bounds = array<i64: 1, 32>}, {transform_indices = @transform_13, window_bounds = array<i64: 1, 17, 32>}]} {
    %c0 = arith.constant 0 : index
    %c0_0 = arith.constant 0 : index
    %c0_1 = arith.constant 0 : index
    %0 = vector.load %arg1[%c0, %c0_0, %c0_1] : memref<1x17x32xbf16, #tpu.memory_space<vmem>>, vector<1x17x32xbf16>
    %1 = arith.extf %0 : vector<1x17x32xbf16> to vector<1x17x32xf32>
    %2 = vector.shape_cast %1 : vector<1x17x32xf32> to vector<17x32xf32>
    %c0_2 = arith.constant 0 : index
    %c0_3 = arith.constant 0 : index
    %3 = vector.load %arg2[%c0_2, %c0_3] : memref<1x32xf32, #tpu.memory_space<vmem>>, vector<1x32xf32>
    %c0_4 = arith.constant 0 : index
    %c0_5 = arith.constant 0 : index
    %4 = vector.load %arg3[%c0_4, %c0_5] : memref<1x32xf32, #tpu.memory_space<vmem>>, vector<1x32xf32>
    %cst = arith.constant dense<0.000000e+00> : vector<17xf32>
    %5 = vector.multi_reduction <add>, %2, %cst [1] : vector<17x32xf32> to vector<17xf32>
    %6 = vector.shape_cast %5 : vector<17xf32> to vector<17x1xf32>
    %cst_6 = arith.constant 3.200000e+01 : f32
    %7 = vector.broadcast %cst_6 : f32 to vector<17x1xf32>
    %8 = arith.divf %6, %7 : vector<17x1xf32>
    %9 = vector.broadcast %8 : vector<17x1xf32> to vector<17x32xf32>
    %10 = arith.subf %2, %9 : vector<17x32xf32>
    %11 = arith.mulf %10, %10 : vector<17x32xf32>
    %cst_7 = arith.constant dense<0.000000e+00> : vector<17xf32>
    %12 = vector.multi_reduction <add>, %11, %cst_7 [1] : vector<17x32xf32> to vector<17xf32>
    %13 = vector.shape_cast %12 : vector<17xf32> to vector<17x1xf32>
    %cst_8 = arith.constant 3.200000e+01 : f32
    %14 = vector.broadcast %cst_8 : f32 to vector<17x1xf32>
    %15 = arith.divf %13, %14 : vector<17x1xf32>
    %16 = vector.broadcast %8 : vector<17x1xf32> to vector<17x32xf32>
    %17 = arith.subf %2, %16 : vector<17x32xf32>
    %cst_9 = arith.constant 9.99999996E-13 : f32
    %18 = vector.broadcast %cst_9 : f32 to vector<17x1xf32>
    %19 = arith.addf %15, %18 : vector<17x1xf32>
    %20 = math.rsqrt %19 : vector<17x1xf32>
    %21 = vector.broadcast %20 : vector<17x1xf32> to vector<17x32xf32>
    %22 = arith.mulf %17, %21 : vector<17x32xf32>
    %23 = vector.broadcast %3 : vector<1x32xf32> to vector<17x32xf32>
    %24 = arith.mulf %22, %23 : vector<17x32xf32>
    %25 = vector.broadcast %4 : vector<1x32xf32> to vector<17x32xf32>
    %26 = arith.addf %24, %25 : vector<17x32xf32>
    %27 = arith.truncf %26 : vector<17x32xf32> to vector<17x32xbf16>
    %c0_10 = arith.constant 0 : index
    %c0_11 = arith.constant 0 : index
    %28 = vector.load %arg4[%c0_10, %c0_11] : memref<32x96xbf16, #tpu.memory_space<vmem>>, vector<32x96xbf16>
    %cst_12 = arith.constant dense<0.000000e+00> : vector<17x96xf32>
    %29 = tpu.matmul %27, %28, %cst_12 {dimension_numbers = #tpu.dot_dimension_numbers<[1], [0], [0], [1], [0, 0, 1, 1], [], []>} : vector<17x32xbf16>, vector<32x96xbf16>, vector<17x96xf32> -> vector<17x96xf32>
    %c0_13 = arith.constant 0 : index
    %c0_14 = arith.constant 0 : index
    %30 = vector.load %arg5[%c0_13, %c0_14] : memref<1x96xf32, #tpu.memory_space<vmem>>, vector<1x96xf32>
    %31 = vector.broadcast %30 : vector<1x96xf32> to vector<17x96xf32>
    %32 = arith.addf %29, %31 : vector<17x96xf32>
    %33 = vector.shape_cast %32 : vector<17x96xf32> to vector<1x17x96xf32>
    %cst_15 = arith.constant 0.000000e+00 : f32
    %34 = vector.broadcast %cst_15 : f32 to vector<17x32xf32>
    %35 = vector.extract_strided_slice %33 {offsets = [0, 0, 0], sizes = [1, 17, 8], strides = [1, 1, 1]} : vector<1x17x96xf32> to vector<1x17x8xf32>
    %36 = vector.extract_strided_slice %33 {offsets = [0, 0, 32], sizes = [1, 17, 8], strides = [1, 1, 1]} : vector<1x17x96xf32> to vector<1x17x8xf32>
    %37 = vector.extract_strided_slice %33 {offsets = [0, 0, 64], sizes = [1, 17, 8], strides = [1, 1, 1]} : vector<1x17x96xf32> to vector<1x17x8xf32>
    "tpu.trace_start"() <{level = 10 : i32, message = "bqd,bkd->bqk"}> : () -> ()
    %cst_16 = arith.constant dense<0.000000e+00> : vector<1x17x17xf32>
    %38 = tpu.matmul %35, %36, %cst_16 {dimension_numbers = #tpu.dot_dimension_numbers<[2], [2], [1], [1], [0, 0, 0, 1, 1, 1], [0], [0]>} : vector<1x17x8xf32>, vector<1x17x8xf32>, vector<1x17x17xf32> -> vector<1x17x17xf32>
    "tpu.trace_stop"() : () -> ()
    %cst_17 = arith.constant dense<0xFF800000> : vector<1x17xf32>
    %39 = vector.multi_reduction <maximumf>, %38, %cst_17 [2] : vector<1x17x17xf32> to vector<1x17xf32>
    %40 = vector.shape_cast %39 : vector<1x17xf32> to vector<1x17x1xf32>
    %41 = vector.broadcast %40 : vector<1x17x1xf32> to vector<1x17x17xf32>
    %42 = arith.subf %38, %41 : vector<1x17x17xf32>
    %43 = math.exp %42 : vector<1x17x17xf32>
    %cst_18 = arith.constant dense<0.000000e+00> : vector<1x17xf32>
    %44 = vector.multi_reduction <add>, %43, %cst_18 [2] : vector<1x17x17xf32> to vector<1x17xf32>
    %45 = vector.shape_cast %44 : vector<1x17xf32> to vector<1x17x1xf32>
    %46 = tpu.reciprocal %45 {approx = true} : vector<1x17x1xf32> -> vector<1x17x1xf32>
    %47 = vector.broadcast %46 : vector<1x17x1xf32> to vector<1x17x17xf32>
    %48 = arith.mulf %43, %47 : vector<1x17x17xf32>
    "tpu.trace_start"() <{level = 10 : i32, message = "bqk,bkd->bqd"}> : () -> ()
    %cst_19 = arith.constant dense<0.000000e+00> : vector<1x17x8xf32>
    %49 = tpu.matmul %48, %37, %cst_19 {dimension_numbers = #tpu.dot_dimension_numbers<[2], [1], [1], [2], [0, 0, 0, 1, 1, 2], [0], [0]>} : vector<1x17x17xf32>, vector<1x17x8xf32>, vector<1x17x8xf32> -> vector<1x17x8xf32>
    "tpu.trace_stop"() : () -> ()
    %50 = vector.shape_cast %49 : vector<1x17x8xf32> to vector<17x8xf32>
    %51 = arith.truncf %50 : vector<17x8xf32> to vector<17x8xbf16>
    %c0_20 = arith.constant 0 : index
    %c0_21 = arith.constant 0 : index
    %52 = vector.load %arg6[%c0_20, %c0_21] : memref<32x32xbf16, #tpu.memory_space<vmem>>, vector<8x32xbf16>
    %cst_22 = arith.constant dense<0.000000e+00> : vector<17x32xf32>
    %53 = tpu.matmul %51, %52, %cst_22 {dimension_numbers = #tpu.dot_dimension_numbers<[1], [0], [0], [1], [0, 0, 1, 1], [], []>} : vector<17x8xbf16>, vector<8x32xbf16>, vector<17x32xf32> -> vector<17x32xf32>
    %54 = arith.addf %34, %53 : vector<17x32xf32>
    %55 = vector.extract_strided_slice %33 {offsets = [0, 0, 8], sizes = [1, 17, 8], strides = [1, 1, 1]} : vector<1x17x96xf32> to vector<1x17x8xf32>
    %56 = vector.extract_strided_slice %33 {offsets = [0, 0, 40], sizes = [1, 17, 8], strides = [1, 1, 1]} : vector<1x17x96xf32> to vector<1x17x8xf32>
    %57 = vector.extract_strided_slice %33 {offsets = [0, 0, 72], sizes = [1, 17, 8], strides = [1, 1, 1]} : vector<1x17x96xf32> to vector<1x17x8xf32>
    "tpu.trace_start"() <{level = 10 : i32, message = "bqd,bkd->bqk"}> : () -> ()
    %cst_23 = arith.constant dense<0.000000e+00> : vector<1x17x17xf32>
    %58 = tpu.matmul %55, %56, %cst_23 {dimension_numbers = #tpu.dot_dimension_numbers<[2], [2], [1], [1], [0, 0, 0, 1, 1, 1], [0], [0]>} : vector<1x17x8xf32>, vector<1x17x8xf32>, vector<1x17x17xf32> -> vector<1x17x17xf32>
    "tpu.trace_stop"() : () -> ()
    %cst_24 = arith.constant dense<0xFF800000> : vector<1x17xf32>
    %59 = vector.multi_reduction <maximumf>, %58, %cst_24 [2] : vector<1x17x17xf32> to vector<1x17xf32>
    %60 = vector.shape_cast %59 : vector<1x17xf32> to vector<1x17x1xf32>
    %61 = vector.broadcast %60 : vector<1x17x1xf32> to vector<1x17x17xf32>
    %62 = arith.subf %58, %61 : vector<1x17x17xf32>
    %63 = math.exp %62 : vector<1x17x17xf32>
    %cst_25 = arith.constant dense<0.000000e+00> : vector<1x17xf32>
    %64 = vector.multi_reduction <add>, %63, %cst_25 [2] : vector<1x17x17xf32> to vector<1x17xf32>
    %65 = vector.shape_cast %64 : vector<1x17xf32> to vector<1x17x1xf32>
    %66 = tpu.reciprocal %65 {approx = true} : vector<1x17x1xf32> -> vector<1x17x1xf32>
    %67 = vector.broadcast %66 : vector<1x17x1xf32> to vector<1x17x17xf32>
    %68 = arith.mulf %63, %67 : vector<1x17x17xf32>
    "tpu.trace_start"() <{level = 10 : i32, message = "bqk,bkd->bqd"}> : () -> ()
    %cst_26 = arith.constant dense<0.000000e+00> : vector<1x17x8xf32>
    %69 = tpu.matmul %68, %57, %cst_26 {dimension_numbers = #tpu.dot_dimension_numbers<[2], [1], [1], [2], [0, 0, 0, 1, 1, 2], [0], [0]>} : vector<1x17x17xf32>, vector<1x17x8xf32>, vector<1x17x8xf32> -> vector<1x17x8xf32>
    "tpu.trace_stop"() : () -> ()
    %70 = vector.shape_cast %69 : vector<1x17x8xf32> to vector<17x8xf32>
    %71 = arith.truncf %70 : vector<17x8xf32> to vector<17x8xbf16>
    %c8 = arith.constant 8 : index
    %c0_27 = arith.constant 0 : index
    %72 = vector.load %arg6[%c8, %c0_27] : memref<32x32xbf16, #tpu.memory_space<vmem>>, vector<8x32xbf16>
    %cst_28 = arith.constant dense<0.000000e+00> : vector<17x32xf32>
    %73 = tpu.matmul %71, %72, %cst_28 {dimension_numbers = #tpu.dot_dimension_numbers<[1], [0], [0], [1], [0, 0, 1, 1], [], []>} : vector<17x8xbf16>, vector<8x32xbf16>, vector<17x32xf32> -> vector<17x32xf32>
    %74 = arith.addf %54, %73 : vector<17x32xf32>
    %75 = vector.extract_strided_slice %33 {offsets = [0, 0, 16], sizes = [1, 17, 8], strides = [1, 1, 1]} : vector<1x17x96xf32> to vector<1x17x8xf32>
    %76 = vector.extract_strided_slice %33 {offsets = [0, 0, 48], sizes = [1, 17, 8], strides = [1, 1, 1]} : vector<1x17x96xf32> to vector<1x17x8xf32>
    %77 = vector.extract_strided_slice %33 {offsets = [0, 0, 80], sizes = [1, 17, 8], strides = [1, 1, 1]} : vector<1x17x96xf32> to vector<1x17x8xf32>
    "tpu.trace_start"() <{level = 10 : i32, message = "bqd,bkd->bqk"}> : () -> ()
    %cst_29 = arith.constant dense<0.000000e+00> : vector<1x17x17xf32>
    %78 = tpu.matmul %75, %76, %cst_29 {dimension_numbers = #tpu.dot_dimension_numbers<[2], [2], [1], [1], [0, 0, 0, 1, 1, 1], [0], [0]>} : vector<1x17x8xf32>, vector<1x17x8xf32>, vector<1x17x17xf32> -> vector<1x17x17xf32>
    "tpu.trace_stop"() : () -> ()
    %cst_30 = arith.constant dense<0xFF800000> : vector<1x17xf32>
    %79 = vector.multi_reduction <maximumf>, %78, %cst_30 [2] : vector<1x17x17xf32> to vector<1x17xf32>
    %80 = vector.shape_cast %79 : vector<1x17xf32> to vector<1x17x1xf32>
    %81 = vector.broadcast %80 : vector<1x17x1xf32> to vector<1x17x17xf32>
    %82 = arith.subf %78, %81 : vector<1x17x17xf32>
    %83 = math.exp %82 : vector<1x17x17xf32>
    %cst_31 = arith.constant dense<0.000000e+00> : vector<1x17xf32>
    %84 = vector.multi_reduction <add>, %83, %cst_31 [2] : vector<1x17x17xf32> to vector<1x17xf32>
    %85 = vector.shape_cast %84 : vector<1x17xf32> to vector<1x17x1xf32>
    %86 = tpu.reciprocal %85 {approx = true} : vector<1x17x1xf32> -> vector<1x17x1xf32>
    %87 = vector.broadcast %86 : vector<1x17x1xf32> to vector<1x17x17xf32>
    %88 = arith.mulf %83, %87 : vector<1x17x17xf32>
    "tpu.trace_start"() <{level = 10 : i32, message = "bqk,bkd->bqd"}> : () -> ()
    %cst_32 = arith.constant dense<0.000000e+00> : vector<1x17x8xf32>
    %89 = tpu.matmul %88, %77, %cst_32 {dimension_numbers = #tpu.dot_dimension_numbers<[2], [1], [1], [2], [0, 0, 0, 1, 1, 2], [0], [0]>} : vector<1x17x17xf32>, vector<1x17x8xf32>, vector<1x17x8xf32> -> vector<1x17x8xf32>
    "tpu.trace_stop"() : () -> ()
    %90 = vector.shape_cast %89 : vector<1x17x8xf32> to vector<17x8xf32>
    %91 = arith.truncf %90 : vector<17x8xf32> to vector<17x8xbf16>
    %c16 = arith.constant 16 : index
    %c0_33 = arith.constant 0 : index
    %92 = vector.load %arg6[%c16, %c0_33] : memref<32x32xbf16, #tpu.memory_space<vmem>>, vector<8x32xbf16>
    %cst_34 = arith.constant dense<0.000000e+00> : vector<17x32xf32>
    %93 = tpu.matmul %91, %92, %cst_34 {dimension_numbers = #tpu.dot_dimension_numbers<[1], [0], [0], [1], [0, 0, 1, 1], [], []>} : vector<17x8xbf16>, vector<8x32xbf16>, vector<17x32xf32> -> vector<17x32xf32>
    %94 = arith.addf %74, %93 : vector<17x32xf32>
    %95 = vector.extract_strided_slice %33 {offsets = [0, 0, 24], sizes = [1, 17, 8], strides = [1, 1, 1]} : vector<1x17x96xf32> to vector<1x17x8xf32>
    %96 = vector.extract_strided_slice %33 {offsets = [0, 0, 56], sizes = [1, 17, 8], strides = [1, 1, 1]} : vector<1x17x96xf32> to vector<1x17x8xf32>
    %97 = vector.extract_strided_slice %33 {offsets = [0, 0, 88], sizes = [1, 17, 8], strides = [1, 1, 1]} : vector<1x17x96xf32> to vector<1x17x8xf32>
    "tpu.trace_start"() <{level = 10 : i32, message = "bqd,bkd->bqk"}> : () -> ()
    %cst_35 = arith.constant dense<0.000000e+00> : vector<1x17x17xf32>
    %98 = tpu.matmul %95, %96, %cst_35 {dimension_numbers = #tpu.dot_dimension_numbers<[2], [2], [1], [1], [0, 0, 0, 1, 1, 1], [0], [0]>} : vector<1x17x8xf32>, vector<1x17x8xf32>, vector<1x17x17xf32> -> vector<1x17x17xf32>
    "tpu.trace_stop"() : () -> ()
    %cst_36 = arith.constant dense<0xFF800000> : vector<1x17xf32>
    %99 = vector.multi_reduction <maximumf>, %98, %cst_36 [2] : vector<1x17x17xf32> to vector<1x17xf32>
    %100 = vector.shape_cast %99 : vector<1x17xf32> to vector<1x17x1xf32>
    %101 = vector.broadcast %100 : vector<1x17x1xf32> to vector<1x17x17xf32>
    %102 = arith.subf %98, %101 : vector<1x17x17xf32>
    %103 = math.exp %102 : vector<1x17x17xf32>
    %cst_37 = arith.constant dense<0.000000e+00> : vector<1x17xf32>
    %104 = vector.multi_reduction <add>, %103, %cst_37 [2] : vector<1x17x17xf32> to vector<1x17xf32>
    %105 = vector.shape_cast %104 : vector<1x17xf32> to vector<1x17x1xf32>
    %106 = tpu.reciprocal %105 {approx = true} : vector<1x17x1xf32> -> vector<1x17x1xf32>
    %107 = vector.broadcast %106 : vector<1x17x1xf32> to vector<1x17x17xf32>
    %108 = arith.mulf %103, %107 : vector<1x17x17xf32>
    "tpu.trace_start"() <{level = 10 : i32, message = "bqk,bkd->bqd"}> : () -> ()
    %cst_38 = arith.constant dense<0.000000e+00> : vector<1x17x8xf32>
    %109 = tpu.matmul %108, %97, %cst_38 {dimension_numbers = #tpu.dot_dimension_numbers<[2], [1], [1], [2], [0, 0, 0, 1, 1, 2], [0], [0]>} : vector<1x17x17xf32>, vector<1x17x8xf32>, vector<1x17x8xf32> -> vector<1x17x8xf32>
    "tpu.trace_stop"() : () -> ()
    %110 = vector.shape_cast %109 : vector<1x17x8xf32> to vector<17x8xf32>
    %111 = arith.truncf %110 : vector<17x8xf32> to vector<17x8xbf16>
    %c24 = arith.constant 24 : index
    %c0_39 = arith.constant 0 : index
    %112 = vector.load %arg6[%c24, %c0_39] : memref<32x32xbf16, #tpu.memory_space<vmem>>, vector<8x32xbf16>
    %cst_40 = arith.constant dense<0.000000e+00> : vector<17x32xf32>
    %113 = tpu.matmul %111, %112, %cst_40 {dimension_numbers = #tpu.dot_dimension_numbers<[1], [0], [0], [1], [0, 0, 1, 1], [], []>} : vector<17x8xbf16>, vector<8x32xbf16>, vector<17x32xf32> -> vector<17x32xf32>
    %114 = arith.addf %94, %113 : vector<17x32xf32>
    %115 = arith.addf %2, %114 : vector<17x32xf32>
    %c0_41 = arith.constant 0 : index
    %c0_42 = arith.constant 0 : index
    %116 = vector.load %arg7[%c0_41, %c0_42] : memref<1x32xf32, #tpu.memory_space<vmem>>, vector<1x32xf32>
    %117 = vector.broadcast %116 : vector<1x32xf32> to vector<17x32xf32>
    %118 = arith.addf %115, %117 : vector<17x32xf32>
    %c0_43 = arith.constant 0 : index
    %c0_44 = arith.constant 0 : index
    %119 = vector.load %arg8[%c0_43, %c0_44] : memref<1x32xf32, #tpu.memory_space<vmem>>, vector<1x32xf32>
    %c0_45 = arith.constant 0 : index
    %c0_46 = arith.constant 0 : index
    %120 = vector.load %arg9[%c0_45, %c0_46] : memref<1x32xf32, #tpu.memory_space<vmem>>, vector<1x32xf32>
    %cst_47 = arith.constant dense<0.000000e+00> : vector<17xf32>
    %121 = vector.multi_reduction <add>, %118, %cst_47 [1] : vector<17x32xf32> to vector<17xf32>
    %122 = vector.shape_cast %121 : vector<17xf32> to vector<17x1xf32>
    %cst_48 = arith.constant 3.200000e+01 : f32
    %123 = vector.broadcast %cst_48 : f32 to vector<17x1xf32>
    %124 = arith.divf %122, %123 : vector<17x1xf32>
    %125 = vector.broadcast %124 : vector<17x1xf32> to vector<17x32xf32>
    %126 = arith.subf %118, %125 : vector<17x32xf32>
    %127 = arith.mulf %126, %126 : vector<17x32xf32>
    %cst_49 = arith.constant dense<0.000000e+00> : vector<17xf32>
    %128 = vector.multi_reduction <add>, %127, %cst_49 [1] : vector<17x32xf32> to vector<17xf32>
    %129 = vector.shape_cast %128 : vector<17xf32> to vector<17x1xf32>
    %cst_50 = arith.constant 3.200000e+01 : f32
    %130 = vector.broadcast %cst_50 : f32 to vector<17x1xf32>
    %131 = arith.divf %129, %130 : vector<17x1xf32>
    %132 = vector.broadcast %124 : vector<17x1xf32> to vector<17x32xf32>
    %133 = arith.subf %118, %132 : vector<17x32xf32>
    %cst_51 = arith.constant 9.99999996E-13 : f32
    %134 = vector.broadcast %cst_51 : f32 to vector<17x1xf32>
    %135 = arith.addf %131, %134 : vector<17x1xf32>
    %136 = math.rsqrt %135 : vector<17x1xf32>
    %137 = vector.broadcast %136 : vector<17x1xf32> to vector<17x32xf32>
    %138 = arith.mulf %133, %137 : vector<17x32xf32>
    %139 = vector.broadcast %119 : vector<1x32xf32> to vector<17x32xf32>
    %140 = arith.mulf %138, %139 : vector<17x32xf32>
    %141 = vector.broadcast %120 : vector<1x32xf32> to vector<17x32xf32>
    %142 = arith.addf %140, %141 : vector<17x32xf32>
    %143 = arith.truncf %142 : vector<17x32xf32> to vector<17x32xbf16>
    %c0_52 = arith.constant 0 : index
    %c0_53 = arith.constant 0 : index
    %144 = vector.load %arg10[%c0_52, %c0_53] : memref<32x64xbf16, #tpu.memory_space<vmem>>, vector<32x64xbf16>
    %cst_54 = arith.constant dense<0.000000e+00> : vector<17x64xf32>
    %145 = tpu.matmul %143, %144, %cst_54 {dimension_numbers = #tpu.dot_dimension_numbers<[1], [0], [0], [1], [0, 0, 1, 1], [], []>} : vector<17x32xbf16>, vector<32x64xbf16>, vector<17x64xf32> -> vector<17x64xf32>
    %c0_55 = arith.constant 0 : index
    %c0_56 = arith.constant 0 : index
    %146 = vector.load %arg11[%c0_55, %c0_56] : memref<1x64xf32, #tpu.memory_space<vmem>>, vector<1x64xf32>
    %147 = vector.broadcast %146 : vector<1x64xf32> to vector<17x64xf32>
    %148 = arith.addf %145, %147 : vector<17x64xf32>
    %149 = arith.mulf %148, %148 : vector<17x64xf32>
    %150 = arith.mulf %148, %149 : vector<17x64xf32>
    %cst_57 = arith.constant 4.471500e-02 : f32
    %151 = vector.broadcast %cst_57 : f32 to vector<17x64xf32>
    %152 = arith.mulf %151, %150 : vector<17x64xf32>
    %153 = arith.addf %148, %152 : vector<17x64xf32>
    %cst_58 = arith.constant 0.797884583 : f32
    %154 = vector.broadcast %cst_58 : f32 to vector<17x64xf32>
    %155 = arith.mulf %154, %153 : vector<17x64xf32>
    %156 = math.tanh %155 : vector<17x64xf32>
    %cst_59 = arith.constant 1.000000e+00 : f32
    %157 = vector.broadcast %cst_59 : f32 to vector<17x64xf32>
    %158 = arith.addf %157, %156 : vector<17x64xf32>
    %cst_60 = arith.constant 5.000000e-01 : f32
    %159 = vector.broadcast %cst_60 : f32 to vector<17x64xf32>
    %160 = arith.mulf %159, %158 : vector<17x64xf32>
    %161 = arith.mulf %148, %160 : vector<17x64xf32>
    %162 = arith.truncf %161 : vector<17x64xf32> to vector<17x64xbf16>
    %c0_61 = arith.constant 0 : index
    %c0_62 = arith.constant 0 : index
    %163 = vector.load %arg12[%c0_61, %c0_62] : memref<64x32xbf16, #tpu.memory_space<vmem>>, vector<64x32xbf16>
    %cst_63 = arith.constant dense<0.000000e+00> : vector<17x32xf32>
    %164 = tpu.matmul %162, %163, %cst_63 {dimension_numbers = #tpu.dot_dimension_numbers<[1], [0], [0], [1], [0, 0, 1, 1], [], []>} : vector<17x64xbf16>, vector<64x32xbf16>, vector<17x32xf32> -> vector<17x32xf32>
    %c0_64 = arith.constant 0 : index
    %c0_65 = arith.constant 0 : index
    %165 = vector.load %arg13[%c0_64, %c0_65] : memref<1x32xf32, #tpu.memory_space<vmem>>, vector<1x32xf32>
    %166 = vector.broadcast %165 : vector<1x32xf32> to vector<17x32xf32>
    %167 = arith.addf %164, %166 : vector<17x32xf32>
    %168 = arith.addf %118, %167 : vector<17x32xf32>
    %169 = vector.shape_cast %168 : vector<17x32xf32> to vector<1x17x32xf32>
    %170 = arith.truncf %169 : vector<1x17x32xf32> to vector<1x17x32xbf16>
    %c0_66 = arith.constant 0 : index
    %c0_67 = arith.constant 0 : index
    %c0_68 = arith.constant 0 : index
    %171 = vector.load %arg14[%c0_66, %c0_67, %c0_68] : memref<1x17x32xbf16, #tpu.memory_space<vmem>>, vector<1x17x32xbf16>
    tpu.vector_store %arg14[%c0_66, %c0_67, %c0_68], %170 {strides = array<i32>} : memref<1x17x32xbf16, #tpu.memory_space<vmem>>, vector<1x17x32xbf16>,
    return
  }
  func.func @transform_0(%arg0: i32) -> (i32, i32, i32) {
    %c0_i32 = arith.constant 0 : i32
    %c0_i32_0 = arith.constant 0 : i32
    %c0_i32_1 = arith.constant 0 : i32
    return %arg0, %c0_i32, %c0_i32_0 : i32, i32, i32
  }
  func.func @transform_1(%arg0: i32) -> (i32, i32) {
    %c0_i32 = arith.constant 0 : i32
    %c0_i32_0 = arith.constant 0 : i32
    %c0_i32_1 = arith.constant 0 : i32
    return %c0_i32, %c0_i32_0 : i32, i32
  }
  func.func @transform_2(%arg0: i32) -> (i32, i32) {
    %c0_i32 = arith.constant 0 : i32
    %c0_i32_0 = arith.constant 0 : i32
    %c0_i32_1 = arith.constant 0 : i32
    return %c0_i32, %c0_i32_0 : i32, i32
  }
  func.func @transform_3(%arg0: i32) -> (i32, i32) {
    %c0_i32 = arith.constant 0 : i32
    %c0_i32_0 = arith.constant 0 : i32
    %c0_i32_1 = arith.constant 0 : i32
    return %c0_i32, %c0_i32_0 : i32, i32
  }
  func.func @transform_4(%arg0: i32) -> (i32, i32) {
    %c0_i32 = arith.constant 0 : i32
    %c0_i32_0 = arith.constant 0 : i32
    %c0_i32_1 = arith.constant 0 : i32
    return %c0_i32, %c0_i32_0 : i32, i32
  }
  func.func @transform_5(%arg0: i32) -> (i32, i32) {
    %c0_i32 = arith.constant 0 : i32
    %c0_i32_0 = arith.constant 0 : i32
    %c0_i32_1 = arith.constant 0 : i32
    return %c0_i32, %c0_i32_0 : i32, i32
  }
  func.func @transform_6(%arg0: i32) -> (i32, i32) {
    %c0_i32 = arith.constant 0 : i32
    %c0_i32_0 = arith.constant 0 : i32
    %c0_i32_1 = arith.constant 0 : i32
    return %c0_i32, %c0_i32_0 : i32, i32
  }
  func.func @transform_7(%arg0: i32) -> (i32, i32) {
    %c0_i32 = arith.constant 0 : i32
    %c0_i32_0 = arith.constant 0 : i32
    %c0_i32_1 = arith.constant 0 : i32
    return %c0_i32, %c0_i32_0 : i32, i32
  }
  func.func @transform_8(%arg0: i32) -> (i32, i32) {
    %c0_i32 = arith.constant 0 : i32
    %c0_i32_0 = arith.constant 0 : i32
    %c0_i32_1 = arith.constant 0 : i32
    return %c0_i32, %c0_i32_0 : i32, i32
  }
  func.func @transform_9(%arg0: i32) -> (i32, i32) {
    %c0_i32 = arith.constant 0 : i32
    %c0_i32_0 = arith.constant 0 : i32
    %c0_i32_1 = arith.constant 0 : i32
    return %c0_i32, %c0_i32_0 : i32, i32
  }
  func.func @transform_10(%arg0: i32) -> (i32, i32) {
    %c0_i32 = arith.constant 0 : i32
    %c0_i32_0 = arith.constant 0 : i32
    %c0_i32_1 = arith.constant 0 : i32
    return %c0_i32, %c0_i32_0 : i32, i32
  }
  func.func @transform_11(%arg0: i32) -> (i32, i32) {
    %c0_i32 = arith.constant 0 : i32
    %c0_i32_0 = arith.constant 0 : i32
    %c0_i32_1 = arith.constant 0 : i32
    return %c0_i32, %c0_i32_0 : i32, i32
  }
  func.func @transform_12(%arg0: i32) -> (i32, i32) {
    %c0_i32 = arith.constant 0 : i32
    %c0_i32_0 = arith.constant 0 : i32
    %c0_i32_1 = arith.constant 0 : i32
    return %c0_i32, %c0_i32_0 : i32, i32
  }
  func.func @transform_13(%arg0: i32) -> (i32, i32, i32) {
    %c0_i32 = arith.constant 0 : i32
    %c0_i32_0 = arith.constant 0 : i32
    %c0_i32_1 = arith.constant 0 : i32
    return %arg0, %c0_i32, %c0_i32_0 : i32, i32, i32
  }
}

module attributes {stable_mosaic.version = 11 : i64} {
  func.func @_head_kernel(%arg0: memref<2x32xbf16, #tpu.memory_space<vmem>>, %arg1: memref<1x32xf32, #tpu.memory_space<vmem>>, %arg2: memref<1x32xf32, #tpu.memory_space<vmem>>, %arg3: memref<32x32xbf16, #tpu.memory_space<vmem>>, %arg4: memref<1x32xf32, #tpu.memory_space<vmem>>, %arg5: memref<32x128xbf16, #tpu.memory_space<vmem>>, %arg6: memref<1x128xf32, #tpu.memory_space<vmem>>, %arg7: memref<2x128xf32, #tpu.memory_space<vmem>>) attributes {dimension_semantics = [], scalar_prefetch = 0 : i64, scratch_operands = 0 : i64, tpu.core_type = #tpu.core_type<tc>} {
    %c0 = arith.constant 0 : index
    %c0_0 = arith.constant 0 : index
    %0 = vector.load %arg0[%c0, %c0_0] : memref<2x32xbf16, #tpu.memory_space<vmem>>, vector<2x32xbf16>
    %1 = arith.extf %0 : vector<2x32xbf16> to vector<2x32xf32>
    %c0_1 = arith.constant 0 : index
    %c0_2 = arith.constant 0 : index
    %2 = vector.load %arg1[%c0_1, %c0_2] : memref<1x32xf32, #tpu.memory_space<vmem>>, vector<1x32xf32>
    %c0_3 = arith.constant 0 : index
    %c0_4 = arith.constant 0 : index
    %3 = vector.load %arg2[%c0_3, %c0_4] : memref<1x32xf32, #tpu.memory_space<vmem>>, vector<1x32xf32>
    %cst = arith.constant dense<0.000000e+00> : vector<2xf32>
    %4 = vector.multi_reduction <add>, %1, %cst [1] : vector<2x32xf32> to vector<2xf32>
    %5 = vector.shape_cast %4 : vector<2xf32> to vector<2x1xf32>
    %cst_5 = arith.constant 3.200000e+01 : f32
    %6 = vector.broadcast %cst_5 : f32 to vector<2x1xf32>
    %7 = arith.divf %5, %6 : vector<2x1xf32>
    %8 = vector.broadcast %7 : vector<2x1xf32> to vector<2x32xf32>
    %9 = arith.subf %1, %8 : vector<2x32xf32>
    %10 = arith.mulf %9, %9 : vector<2x32xf32>
    %cst_6 = arith.constant dense<0.000000e+00> : vector<2xf32>
    %11 = vector.multi_reduction <add>, %10, %cst_6 [1] : vector<2x32xf32> to vector<2xf32>
    %12 = vector.shape_cast %11 : vector<2xf32> to vector<2x1xf32>
    %cst_7 = arith.constant 3.200000e+01 : f32
    %13 = vector.broadcast %cst_7 : f32 to vector<2x1xf32>
    %14 = arith.divf %12, %13 : vector<2x1xf32>
    %15 = vector.broadcast %7 : vector<2x1xf32> to vector<2x32xf32>
    %16 = arith.subf %1, %15 : vector<2x32xf32>
    %cst_8 = arith.constant 9.99999996E-13 : f32
    %17 = vector.broadcast %cst_8 : f32 to vector<2x1xf32>
    %18 = arith.addf %14, %17 : vector<2x1xf32>
    %19 = math.rsqrt %18 : vector<2x1xf32>
    %20 = vector.broadcast %19 : vector<2x1xf32> to vector<2x32xf32>
    %21 = arith.mulf %16, %20 : vector<2x32xf32>
    %22 = vector.broadcast %2 : vector<1x32xf32> to vector<2x32xf32>
    %23 = arith.mulf %21, %22 : vector<2x32xf32>
    %24 = vector.broadcast %3 : vector<1x32xf32> to vector<2x32xf32>
    %25 = arith.addf %23, %24 : vector<2x32xf32>
    %26 = arith.truncf %25 : vector<2x32xf32> to vector<2x32xbf16>
    %c0_9 = arith.constant 0 : index
    %c0_10 = arith.constant 0 : index
    %27 = vector.load %arg3[%c0_9, %c0_10] : memref<32x32xbf16, #tpu.memory_space<vmem>>, vector<32x32xbf16>
    %cst_11 = arith.constant dense<0.000000e+00> : vector<2x32xf32>
    %28 = tpu.matmul %26, %27, %cst_11 {dimension_numbers = #tpu.dot_dimension_numbers<[1], [0], [0], [1], [0, 0, 1, 1], [], []>} : vector<2x32xbf16>, vector<32x32xbf16>, vector<2x32xf32> -> vector<2x32xf32>
    %c0_12 = arith.constant 0 : index
    %c0_13 = arith.constant 0 : index
    %29 = vector.load %arg4[%c0_12, %c0_13] : memref<1x32xf32, #tpu.memory_space<vmem>>, vector<1x32xf32>
    %30 = vector.broadcast %29 : vector<1x32xf32> to vector<2x32xf32>
    %31 = arith.addf %28, %30 : vector<2x32xf32>
    %32 = math.tanh %31 : vector<2x32xf32>
    %33 = arith.truncf %32 : vector<2x32xf32> to vector<2x32xbf16>
    %c0_14 = arith.constant 0 : index
    %c0_15 = arith.constant 0 : index
    %34 = vector.load %arg5[%c0_14, %c0_15] : memref<32x128xbf16, #tpu.memory_space<vmem>>, vector<32x128xbf16>
    %cst_16 = arith.constant dense<0.000000e+00> : vector<2x128xf32>
    %35 = tpu.matmul %33, %34, %cst_16 {dimension_numbers = #tpu.dot_dimension_numbers<[1], [0], [0], [1], [0, 0, 1, 1], [], []>} : vector<2x32xbf16>, vector<32x128xbf16>, vector<2x128xf32> -> vector<2x128xf32>
    %c0_17 = arith.constant 0 : index
    %c0_18 = arith.constant 0 : index
    %36 = vector.load %arg6[%c0_17, %c0_18] : memref<1x128xf32, #tpu.memory_space<vmem>>, vector<1x128xf32>
    %37 = vector.broadcast %36 : vector<1x128xf32> to vector<2x128xf32>
    %38 = arith.addf %35, %37 : vector<2x128xf32>
    %c0_19 = arith.constant 0 : index
    %c0_20 = arith.constant 0 : index
    %39 = vector.load %arg7[%c0_19, %c0_20] : memref<2x128xf32, #tpu.memory_space<vmem>>, vector<2x128xf32>
    tpu.vector_store %arg7[%c0_19, %c0_20], %38 {strides = array<i32>} : memref<2x128xf32, #tpu.memory_space<vmem>>, vector<2x128xf32>,
    return
  }
}

</mosaic_0001>

<bundles_post_ra>
// kernel: _lambda_.4
= control target key start
LH: loop header
LB: loop body
LE: loop exit
PB: predicated region body
PF: predicated region fallthrough
CT: control target
= control target key end

     0   :  { %v291_v0 = vmov 0   ;;  %vm140_vm0 = vcmask 523264   ;;  %vm212_vm1 = vcmask 257024   ;;  %s399_s1 = inlined_call_operand.vmem [shape: bf16[192,32], index: 1, kind: input, shape index: {}]   ;;  %s400_s0 = inlined_call_operand.vmem [shape: bf16[32,192], index: 0, kind: input, shape index: {}]   ;;  %s401_s2 = inlined_call_operand.vmem [shape: f32[1,32], index: 2, kind: input, shape index: {}]   ;;  %s402_s3 = inlined_call_operand.vmem [shape: bf16[32,32], index: 3, kind: output, shape index: {}]  }
   0x1   :  { %147 = vmatprep.subr.bf16.mxu0 %v291_v0  ;;  %248 = vmatprep.subr.bf16.mxu1 %v291_v0  ;;  %v273_v1 = vld [vmem:[%s399_s1] sm:$0xff]   ;;  %v274_v2 = vld [vmem:[%s399_s1 + $0x8] sm:$0xff]   ;;  %v275_v3 = vld [vmem:[%s399_s1 + $0x10] sm:$0xff]  }
   0x2   :  { %148 = vmatpush1.bf16.msra.mxu0 %v273_v1  ;;  %260 = vmatpush1.bf16.msra.mxu1 %v273_v1  ;;  %v276_v4 = vld [vmem:[%s399_s1 + $0x18] sm:$0xff]   ;;  %v287_v5 = vld [vmem:[%s400_s0 + $0x4] ss:$8 sps:$4 sm:$0xff]   ;;  %v279_v9 = vld [vmem:[%s399_s1 + $0x30] sm:$0xff]  }
   0x3   :  { %149 = vmatprep.subr.bf16.mxu0 %v291_v0  ;;  %249 = vmatprep.subr.bf16.mxu1 %v291_v0  ;;  %v277_v6 = vld [vmem:[%s399_s1 + $0x20] sm:$0xff]   ;;  %v290_v7 = vld [vmem:[%s400_s0 + $0x14] ss:$8 sps:$4 sm:$0xff]   ;;  %v278_v8 = vld [vmem:[%s399_s1 + $0x28] sm:$0xff]  }
   0x4   :  { %238 = vmatprep.mubr.msk.bf16.mxu0 %vm140_vm0, %v287_v5  ;;  %239 = vmatprep.mubr.msk.bf16.mxu1 %vm140_vm0, %v290_v7  ;;  %v280_v10 = vld [vmem:[%s399_s1 + $0x38] sm:$0xff]   ;;  %v281_v11 = vld [vmem:[%s399_s1 + $0x40] sm:$0xff]   ;;  %v282_v12 = vld [vmem:[%s399_s1 + $0x48] sm:$0xff]  }
   0x5   :  { %v283_v13 = vld [vmem:[%s399_s1 + $0x50] sm:$0xff]   ;;  %v284_v14 = vld [vmem:[%s399_s1 + $0x58] sm:$0xff]   ;;  %v285_v15 = vld [vmem:[%s400_s0] ss:$8 sps:$4 sm:$0xff]  }
   0x6   :  { %150 = vmatpush1.bf16.msra.mxu0 %v274_v2  ;;  %261 = vmatpush1.bf16.msra.mxu1 %v274_v2  ;;  %v288_v16 = vld [vmem:[%s400_s0 + $0x10] ss:$8 sps:$4 sm:$0xff]   ;;  %v221_v17 = vld [vmem:[%s401_s2] ss:$0 sm:$0xff] }
   0x7   :  { %151 = vmatprep.subr.bf16.mxu0 %v291_v0  ;;  %250 = vmatprep.subr.bf16.mxu1 %v291_v0 }
   0xa   :  { %152 = vmatpush1.bf16.msra.mxu0 %v275_v3  ;;  %262 = vmatpush1.bf16.msra.mxu1 %v275_v3 }
   0xb   :  { %153 = vmatprep.subr.bf16.mxu0 %v291_v0  ;;  %251 = vmatprep.subr.bf16.mxu1 %v291_v0 }
   0xe   :  { %154 = vmatpush1.bf16.msra.mxu0 %v276_v4  ;;  %263 = vmatpush1.bf16.msra.mxu1 %v276_v4 }
   0xf   :  { %155 = vmatprep.subr.bf16.mxu0 %v291_v0  ;;  %252 = vmatprep.subr.bf16.mxu1 %v291_v0 }
  0x12   :  { %156 = vmatpush1.bf16.msra.mxu0 %v277_v6  ;;  %264 = vmatpush1.bf16.msra.mxu1 %v277_v6 }
  0x13   :  { %157 = vmatprep.subr.bf16.mxu0 %v291_v0  ;;  %253 = vmatprep.subr.bf16.mxu1 %v291_v0 }
  0x16   :  { %158 = vmatpush1.bf16.msra.mxu0 %v278_v8  ;;  %265 = vmatpush1.bf16.msra.mxu1 %v278_v8 }
  0x17   :  { %159 = vmatprep.subr.bf16.mxu0 %v291_v0  ;;  %254 = vmatprep.subr.bf16.mxu1 %v291_v0 }
  0x1a   :  { %160 = vmatpush1.bf16.msra.mxu0 %v279_v9  ;;  %266 = vmatpush1.bf16.msra.mxu1 %v279_v9 }
  0x1b   :  { %161 = vmatprep.subr.bf16.mxu0 %v291_v0  ;;  %255 = vmatprep.subr.bf16.mxu1 %v291_v0 }
  0x1e   :  { %162 = vmatpush1.bf16.msra.mxu0 %v280_v10  ;;  %267 = vmatpush1.bf16.msra.mxu1 %v280_v10 }
  0x1f   :  { %163 = vmatprep.subr.bf16.mxu0 %v291_v0  ;;  %256 = vmatprep.subr.bf16.mxu1 %v291_v0 }
  0x22   :  { %164 = vmatpush1.bf16.msra.mxu0 %v281_v11  ;;  %268 = vmatpush1.bf16.msra.mxu1 %v281_v11 }
  0x23   :  { %165 = vmatprep.subr.bf16.mxu0 %v291_v0  ;;  %257 = vmatprep.subr.bf16.mxu1 %v291_v0 }
  0x26   :  { %166 = vmatpush1.bf16.msra.mxu0 %v282_v12  ;;  %269 = vmatpush1.bf16.msra.mxu1 %v282_v12 }
  0x27   :  { %167 = vmatprep.subr.bf16.mxu0 %v291_v0  ;;  %258 = vmatprep.subr.bf16.mxu1 %v291_v0 }
  0x2a   :  { %168 = vmatpush1.bf16.msra.mxu0 %v283_v13  ;;  %270 = vmatpush1.bf16.msra.mxu1 %v283_v13 }
  0x2b   :  { %169 = vmatprep.subr.bf16.mxu0 %v291_v0  ;;  %259 = vmatprep.subr.bf16.mxu1 %v291_v0 }
  0x2e   :  { %170 = vmatpush1.bf16.msra.mxu0 %v284_v14  ;;  %271 = vmatpush1.bf16.msra.mxu1 %v284_v14 }
  0x31   :  { %180 = vmatmul.mubr.bf16.vlgmr.msra.gmra.mrb[0].mxu0 %v285_v15  ;;  %188 = vmatmul.mubr.bf16.vlgmr.msra.gmra.mrb[0].mxu1 %v288_v16 }
 0x104   :  { %v181_v18 = vpop.f32.mrb[0].mxu0  ;;  %v189_v19 = vpop.f32.mrb[0].mxu1 }
 0x105   :  { %v182_v20 = vadd.f32 %v221_v17, %v181_v18  ;;  %v190_v21 = vadd.f32 %v221_v17, %v189_v19  ;;  %v183_v22 = vpop.f32.mrb[1].mxu0  ;;  %v191_v23 = vpop.f32.mrb[1].mxu1 }
 0x106   :  { %v184_v24 = vpop.f32.mrb[2].mxu0  ;;  %v192_v25 = vpop.f32.mrb[2].mxu1 }
 0x107   :  { %v244_v26 = vpack.c.bf16 %v182_v20, %v182_v20  ;;  %v246_v27 = vpack.c.bf16 %v190_v21, %v190_v21  ;;  %v185_v28 = vadd.f32 %v221_v17, %v184_v24  ;;  %v193_v29 = vadd.f32 %v221_v17, %v192_v25  ;;  %v186_v30 = vpop.f32.mrb[3].mxu0  ;;  %v194_v31 = vpop.f32.mrb[3].mxu1 }
 0x109   :  { %213 = vst.msk [vmem:[%s402_s3] sm:$0xf] %vm212_vm1, %v244_v26  ;;  %215 = vst.msk [vmem:[%s402_s3 + $0x8] sm:$0xf] %vm212_vm1, %v246_v27  ;;  %v245_v32 = vpack.c.bf16 %v185_v28, %v185_v28  ;;  %v247_v33 = vpack.c.bf16 %v193_v29, %v193_v29 }
 0x10b   :  { %214 = vst.msk [vmem:[%s402_s3 + $0x4] sm:$0xf] %vm212_vm1, %v245_v32  ;;  %216 = vst.msk [vmem:[%s402_s3 + $0xc] sm:$0xf] %vm212_vm1, %v247_v33 }

// kernel: _lambda_.7
= control target key start
LH: loop header
LB: loop body
LE: loop exit
PB: predicated region body
PF: predicated region fallthrough
CT: control target
= control target key end

     0   :  { %vm32_vm0 = vcmask 254976   ;;  %s363_s0 = inlined_call_operand.vmem [shape: bf16[2,32], index: 0, kind: input, shape index: {}]   ;;  %s364_s1 = inlined_call_operand.vmem [shape: f32[1,32], index: 1, kind: input, shape index: {}]   ;;  %s365_s2 = inlined_call_operand.vmem [shape: f32[1,32], index: 2, kind: input, shape index: {}]   ;;  %s366_s3 = inlined_call_operand.vmem [shape: bf16[32,32], index: 3, kind: input, shape index: {}]   ;;  %s367_s4 = inlined_call_operand.vmem [shape: f32[1,32], index: 4, kind: input, shape index: {}]   ;;  %s368_s5 = inlined_call_operand.vmem [shape: bf16[32,128], index: 5, kind: input, shape index: {}]   ;;  %s369_s6 = inlined_call_operand.vmem [shape: f32[1,128], index: 6, kind: input, shape index: {}]   ;;  %s370_s7 = inlined_call_operand.hbm [shape: f32[2,128], index: 7, kind: output, shape index: {}]  }
   0x1   :  { %v28_v0 = vld [vmem:[%s363_s0] sm:$0x1] }
   0x2   :  { %v29_v1 = vunpack.c.l.bf16 %v28_v0 }
   0x4   :  { %v33_v2 = vsel %vm32_vm0, %v29_v1, 0.0 }
   0x5   :  { %12 = vsyncpa [#allocation3], 0  ;;  %34 = vadd.xlane.f32.xlu0 %v33_v2  ;;  %v247_v8 = vld [vmem:[%s366_s3] sm:$0xff]   ;;  %v279_v9 = vmov 0.0   ;;  %v248_v10 = vld [vmem:[%s366_s3 + $0x8] sm:$0xff]   ;;  %vm280_vm1 = vmmov 0  }
   0x6   :  { %228 = vmatprep.subr.bf16.mxu0 %v279_v9  ;;  %236 = vmatprep.subr.bf16.mxu1 %v279_v9  ;;  %v212_v15 = vld [vmem:[%s364_s1] ss:$0 sm:$0xff]  ;;  %vm85_vm2 = vcmask 261120   ;;  %v250_v22 = vld [vmem:[%s368_s5 + $0x8] sm:$0xff]  }
   0x7   :  { %229 = vmatpush3.bf16.msra.mxu0 %v247_v8  ;;  %232 = vmatprep.mubr.msk.bf16.mxu0 %vm280_vm1, %v279_v9  ;;  %v213_v17 = vld [vmem:[%s365_s2] ss:$0 sm:$0xff] }
   0x8   :  { %230 = vmatprep.subr.bf16.mxu0 %v279_v9  ;;  %240 = vmatprep.mubr.msk.bf16.mxu1 %vm280_vm1, %v279_v9  ;;  %v249_v21 = vld [vmem:[%s368_s5] sm:$0xff]   ;;  %s281_s5 = smov [#allocation2]  }
   0x9   :  { %237 = vmatpush3.bf16.msra.mxu1 %v249_v21  ;;  %v214_v23 = vld [vmem:[%s367_s4] ss:$0 sm:$0xff]  ;;  %s204_s15 = sshll.u32 %s281_s5, 4  ;;  %s205_s15 = int_to_ptr.vmem [resolvable:$true] %s204_s15 }
   0xa   :  { %238 = vmatprep.subr.bf16.mxu1 %v279_v9  ;;  %v218_v31 = vld [vmem:[%s369_s6] ss:$0 sm:$0xff]  ;;  %s255_s4 = scalar_lea.vmem %s205_s15, 32  ;;  %p260_p1 = scmp.lt.s32.totalorder %s205_s15, %s205_s15 }
   0xb   :  { %231 = vmatpush3.bf16.msra.mxu0 %v248_v10  ;;  %p256_p0 = scmp.ne.s32.totalorder %s205_s15, %s255_s4  ;;  %p261_p2 = scmp.lt.s32.totalorder %s255_s4, %s255_s4 }
   0xd   :  { %239 = vmatpush3.bf16.msra.mxu1 %v250_v22  ;;  %p262_p3 = por %p261_p2, %p260_p1 }
   0xf   :  { %p263_p4 = pnand %p262_p3, %p256_p0 }
  0x92   :  { %v35_v3 = vpop.xlane.xlu0 %34 }
  0x93   :  { %v37_v4 = vmul.f32 0.03125, %v35_v3 }
  0x95   :  { %v38_v5 = vsub.f32 %v29_v1, %v37_v4 }
  0x97   :  { %v39_v6 = vmul.f32 %v38_v5, %v38_v5 }
  0x99   :  { %v40_v7 = vsel %vm32_vm0, %v39_v6, 0.0 }
  0x9a   :  { %41 = vadd.xlane.f32.xlu0 %v40_v7 }
 0x127   :  { %v42_v11 = vpop.xlane.xlu0 %41 }
 0x128   :  { %v43_v12 = vmul.f32 0.03125, %v42_v11 }
 0x12a   :  { %v44_v13 = vadd.f32 1e-12, %v43_v12 }
 0x12c   :  { %251 = vrsqrt.f32 %v44_v13 }
 0x136   :  { %v252_v14 = vpop.eup %251 }
 0x137   :  { %v46_v16 = vmul.f32 %v252_v14, %v38_v5 }
 0x139   :  { %v53_v18 = vmul.f32 %v212_v15, %v46_v16 }
 0x13b   :  { %v60_v19 = vadd.f32 %v213_v17, %v53_v18 }
 0x13d   :  { %v61_v20 = vpack.c.bf16 %v60_v19, %v60_v19 }
 0x13f   :  { %233 = vmatmul.mubr.msk.bf16.vlgmr.msra.gmra.mrb[0].mxu0 %vm85_vm2, %v61_v20 }
 0x212   :  { %v123_v24 = vpop.f32.mrb[0].mxu0 }
 0x213   :  { %v124_v25 = vadd.f32 %v214_v23, %v123_v24  ;;  %v234_v26 = vpop.f32.mrb[1].mxu0 }
 0x214   :  { %v126_v27 = vpop.f32.mrb[2].mxu0 }
 0x215   :  { %253 = vtanh.f32 %v124_v25  ;;  %v235_v28 = vpop.f32.mrb[3].mxu0 }
 0x21f   :  { %v254_v29 = vpop.eup %253 }
 0x220   :  { %v130_v30 = vpack.c.bf16 %v254_v29, %v254_v29 }
 0x222   :  { %241 = vmatmul.mubr.msk.bf16.vlgmr.msra.gmra.mrb[0].mxu1 %vm85_vm2, %v130_v30 }
 0x2f5   :  { %v191_v32 = vpop.f32.mrb[0].mxu1 }
 0x2f6   :  { %v192_v33 = vadd.f32 %v218_v31, %v191_v32  ;;  %v242_v34 = vpop.f32.mrb[1].mxu1 }
 0x2f7   :  { %v194_v35 = vpop.f32.mrb[2].mxu1 }
 0x2f8   :  { %197 = vst [vmem:[#allocation2] sm:$0x3] %v192_v33  ;;  %v243_v36 = vpop.f32.mrb[3].mxu1 }
 0x2f9   :  { %266 = shalt.err (!%p263_p4)
}
 0x2fa   :  { %s267_s6 = scalar_lea.hbm %s370_s7, 32 }
 0x2fb   :  { %p268_p5 = scmp.ne.s32.totalorder %s370_s7, %s267_s6  ;;  %p271_p6 = scmp.lt.u32.totalorder %s267_s6, %s370_s7 }
 0x2fd   :  { %p273_p7 = pnand %p271_p6, %p268_p5 }
 0x2ff   :  { %276 = shalt.err (!%p273_p7)
}
 0x300   :  { %207 = dma.vmem_to_hbm [thread:$0]  %s205_s15, 32, %s370_s7, [#allocation3]  }
 0x301   :  { %277 = dma.done.wait [#allocation3], 32  }
 0x302   :  { %278 = vsyncadd [#allocation3], 4294967264 }
 0x303   :  { %211 = vsyncpa [#allocation3], 1 }

// kernel: _lambda_.5
= control target key start
LH: loop header
LB: loop body
LE: loop exit
PB: predicated region body
PF: predicated region fallthrough
CT: control target
= control target key end

     0   :  { %s2731_s25 = smov 0   ;;  %s3079_s0 = inlined_call_operand.vmem [shape: bf16[2,17,32], index: 0, kind: input, shape index: {}]   ;;  %s3080_s1 = inlined_call_operand.vmem [shape: f32[1,32], index: 1, kind: input, shape index: {}]   ;;  %s3081_s2 = inlined_call_operand.vmem [shape: f32[1,32], index: 2, kind: input, shape index: {}]   ;;  %s3082_s3 = inlined_call_operand.vmem [shape: bf16[32,96], index: 3, kind: input, shape index: {}]   ;;  %s3083_s4 = inlined_call_operand.vmem [shape: f32[1,96], index: 4, kind: input, shape index: {}]   ;;  %s3084_s5 = inlined_call_operand.vmem [shape: bf16[32,32], index: 5, kind: input, shape index: {}]   ;;  %s3085_s6 = inlined_call_operand.vmem [shape: f32[1,32], index: 6, kind: input, shape index: {}]   ;;  %s3086_s7 = inlined_call_operand.vmem [shape: f32[1,32], index: 7, kind: input, shape index: {}]   ;;  %s3087_s8 = inlined_call_operand.vmem [shape: f32[1,32], index: 8, kind: input, shape index: {}]   ;;  %s3088_s9 = inlined_call_operand.vmem [shape: bf16[32,64], index: 9, kind: input, shape index: {}]   ;;  %s3089_s10 = inlined_call_operand.vmem [shape: f32[1,64], index: 10, kind: input, shape index: {}]   ;;  %s3090_s11 = inlined_call_operand.vmem [shape: bf16[64,32], index: 11, kind: input, shape index: {}]   ;;  %s3091_s12 = inlined_call_operand.vmem [shape: f32[1,32], index: 12, kind: input, shape index: {}]   ;;  %s3092_s13 = inlined_call_operand.vmem [shape: bf16[2,17,32], index: 13, kind: output, shape index: {}]  }
   0x1 LB: > { %s2135_s26 = sadd.s32 4294967295, %s2645_s25   ;;  %p2139_p0 = scmp.ge.s32.totalorder %s2645_s25, 1  ;;  %s2645_s25 = sphi %s2731_s25, %s23_s25  }
   0x2   : > { %p387_p1 = scmp.lt.s32.totalorder %s2645_s25, 3 }
   0x4   : > { %p388_p2 = pnand %p2139_p0, %p387_p1 }
   0x5   : > { %p431_p3 = scmp.lt.s32.totalorder (!%p388_p2), %s2135_s26, 1  ;;  %vm450_vm0 = vcmask (!%p388_p2), 261120   ;;  %vm457_vm1 = vcmask (!%p388_p2), 253952   ;;  %v2565_v23 = vld [vmem:[%s3082_s3] sm:$0xff] (!%p388_p2)   ;;  %v2566_v24 = vld [vmem:[%s3082_s3 + $0x8] sm:$0xff] (!%p388_p2)   ;;  %v2647_v51 = vmov (!%p388_p2), 0.0|0.0  }
   0x6   : > { %391 = sbr.rel (%p388_p2) target bundleno = 3459 (0xd83), region = 72  ;;  %2298 = vmatprep.subr.bf16.mxu0 (!%p388_p2), %v2565_v23  ;;  %v2142_v36 = vld [vmem:[%s3080_s1] ss:$0 sm:$0xff] (!%p388_p2)  ;;  %2470 = vmatprep.subr.bf16.mxu1 (!%p388_p2), %v2647_v51  ;;  %s2648_s24 = smov (!%p388_p2), 96   ;;  %vm2650_vm2 = vmmov (!%p388_p2), 0   ;;  %v2651_v60 = vmov (!%p388_p2), 0.0  }
   0x7   : > { %2299 = vmatpush3.bf16.msra.mxu0 (!%p388_p2), %v2565_v23  ;;  %v2143_v42 = vld [vmem:[%s3081_s2] ss:$0 sm:$0xff] (!%p388_p2)  ;;  %s2649_s28 = smov (!%p388_p2), 88   ;;  %2312 = vmatprep.mubr.msk.f32.mxu1 (!%p388_p2), %vm2650_vm2, %v2651_v60  ;;  %s2652_s29 = smov (!%p388_p2), 120   ;;  %vm598_vm3 = vcmask (!%p388_p2), 64512   ;;  %vm691_vm5 = vcmask (!%p388_p2), 138240  }
   0x8   : > { %2300 = vmatprep.subr.bf16.mxu0 (!%p388_p2), %v2566_v24  ;;  %v2144_v50 = vld [vmem:[%s3083_s4] ss:$0 sm:$0xff] (!%p388_p2)  ;;  %vm2807_vm4 = vmpackc.low (!%p388_p2), %vm598_vm3, %vm598_vm3  ;;  %vm698_vm6 = vcmask (!%p388_p2), 131072   ;;  %vm743_vm7 = vcmask (!%p388_p2), 1040384   ;;  %s2654_s14 = smov (!%p388_p2), 56   ;;  %s2655_s15 = smov (!%p388_p2), 80  }
   0x9   : > { %s2656_s16 = smov (!%p388_p2), 112   ;;  %s2657_s17 = smov (!%p388_p2), 72   ;;  %vm1074_vm8 = vcmask (!%p388_p2), 1043456   ;;  %vm2000_vm9 = vcmask (!%p388_p2), 523264   ;;  %vm2075_vm10 = vsmask.f32 (!%p388_p2), 256 }
   0xa   : > { %s2658_s18 = smov (!%p388_p2), 104   ;;  %s2659_s23 = smov (!%p388_p2), 48   ;;  %vm2076_vm11 = vmand (!%p388_p2), %vm457_vm1, %vm2075_vm10  ;;  %vm2071_vm12 = vcmask (!%p388_p2), 257024  }
   0xb   : > { %2301 = vmatpush3.bf16.msra.mxu0 (!%p388_p2), %v2566_v24 }
   0xc   : > { %2474 = vmatprep.subr.bf16.mxu0 (!%p388_p2), %v2647_v51 }
   0xd   : > { %s3096_s26 = smov (!%p431_p3, %s2135_s26), 1 }
   0xe   : > { %s2502_s27 = smul.u32 12, %s3096_s26 }
  0x10   : > { %s435_s30 = scalar_lea.vmem %s3079_s0, %s2502_s27 }
  0x11   : > { %v2221_v0 = vld [vmem:[%s435_s30] sm:$0xff]   ;;  %v444_v1 = vld [vmem:[%s435_s30 + $0x8] sm:$0x1]  ;;  %s2653_s30 = smov 64  }
  0x12   : > { %v2747_v2 = vunpack.c.l.bf16 %v2221_v0  ;;  %v2749_v3 = vunpack.c.l.bf16 %v444_v1  ;;  %v2751_v4 = vunpack.c.h.bf16 %v2221_v0 }
  0x14   : > { %v451_v5 = vsel %vm450_vm0, %v2747_v2, 0.0  ;;  %v458_v6 = vsel %vm457_vm1, %v2749_v3, 0.0  ;;  %v454_v7 = vsel %vm450_vm0, %v2751_v4, 0.0 }
  0x15   : > { %452 = vadd.xlane.f32.xlu0 %v451_v5  ;;  %459 = vadd.xlane.f32.xlu1 %v458_v6 }
  0x19   : > { %455 = vadd.xlane.f32.xlu0 %v454_v7 }
  0xa2   : > { %v453_v8 = vpop.xlane.xlu0 %452  ;;  %v460_v9 = vpop.xlane.xlu1 %459 }
  0xa3   : > { %v462_v10 = vmul.f32 0.03125, %v453_v8  ;;  %v464_v11 = vmul.f32 0.03125, %v460_v9 }
  0xa5   : > { %v465_v12 = vsub.f32 %v2747_v2, %v462_v10  ;;  %v467_v13 = vsub.f32 %v2749_v3, %v464_v11 }
  0xa6   : > { %v456_v14 = vpop.xlane.xlu0 %455 }
  0xa7   : > { %v463_v15 = vmul.f32 0.03125, %v456_v14  ;;  %v468_v16 = vmul.f32 %v465_v12, %v465_v12  ;;  %v470_v17 = vmul.f32 %v467_v13, %v467_v13 }
  0xa9   : > { %v466_v18 = vsub.f32 %v2751_v4, %v463_v15  ;;  %v471_v19 = vsel %vm450_vm0, %v468_v16, 0.0  ;;  %v477_v20 = vsel %vm457_vm1, %v470_v17, 0.0 }
  0xaa   : > { %472 = vadd.xlane.f32.xlu1 %v471_v19 }
  0xab   : > { %v469_v21 = vmul.f32 %v466_v18, %v466_v18 }
  0xad   : > { %v474_v22 = vsel %vm450_vm0, %v469_v21, 0.0 }
  0xae   : > { %478 = vadd.xlane.f32.xlu1 %v477_v20  ;;  %475 = vadd.xlane.f32.xlu0 %v474_v22 }
 0x137   : > { %v473_v25 = vpop.xlane.xlu1 %472 }
 0x138   : > { %v480_v26 = vmul.f32 0.03125, %v473_v25 }
 0x13a   : > { %v483_v27 = vadd.f32 1e-12, %v480_v26 }
 0x13b   : > { %v479_v28 = vpop.xlane.xlu1 %478  ;;  %v476_v29 = vpop.xlane.xlu0 %475 }
 0x13c   : > { %2573 = vrsqrt.f32 %v483_v27  ;;  %v482_v30 = vmul.f32 0.03125, %v479_v28  ;;  %v481_v31 = vmul.f32 0.03125, %v476_v29 }
 0x13e   : > { %v485_v32 = vadd.f32 1e-12, %v482_v30  ;;  %v484_v33 = vadd.f32 1e-12, %v481_v31 }
 0x140   : > { %2575 = vrsqrt.f32 %v485_v32 }
 0x141   : > { %2577 = vrsqrt.f32 %v484_v33 }
 0x146   : > { %v2574_v34 = vpop.eup %2573 }
 0x147   : > { %v489_v35 = vmul.f32 %v2574_v34, %v465_v12 }
 0x149   : > { %v498_v41 = vmul.f32 %v2142_v36, %v489_v35 }
 0x14a   : > { %v2576_v37 = vpop.eup %2575 }
 0x14b   : > { %v2578_v38 = vpop.eup %2577  ;;  %v491_v39 = vmul.f32 %v2576_v37, %v467_v13  ;;  %v507_v46 = vadd.f32 %v2143_v42, %v498_v41 }
 0x14c   : > { %v490_v40 = vmul.f32 %v2578_v38, %v466_v18 }
 0x14d   : > { %v500_v43 = vmul.f32 %v2142_v36, %v491_v39 }
 0x14e   : > { %v499_v44 = vmul.f32 %v2142_v36, %v490_v40 }
 0x14f   : > { %v509_v45 = vadd.f32 %v2143_v42, %v500_v43 }
 0x150   : > { %v508_v47 = vadd.f32 %v2143_v42, %v499_v44 }
 0x151   : > { %v511_v48 = vpack.c.bf16 %v509_v45, %v509_v45 }
 0x152   : > { %v510_v49 = vpack.c.bf16 %v508_v47, %v507_v46 }
 0x154   : > { %2302 = vmatprep.mubr.msk.bf16.mxu0 %vm450_vm0, %v510_v49 }
 0x155   : > { %2303 = vmatmul.mubr.msk.bf16.vlgmr.msra.gmra.mrb[0].mxu0 %vm450_vm0, %v511_v48 }
 0x156   : > { %2327 = vmatprep.mubr.msk.f32.mxu0 %vm2650_vm2, %v2651_v60 }
 0x228   : > { %v2304_v52 = vpop.f32.mrb[0].mxu0 }
 0x229   : > { %v2784_v53 = vadd.f32 %v2304_v52, %v2144_v50  ;;  %v575_v54 = vpop.f32.mrb[1].mxu0 }
 0x22a   : > { %v2305_v55 = vpop.f32.mrb[2].mxu0  ;;  %v2787_v57 = vadd.f32 %v2144_v50, %v575_v54 }
 0x22b   : > { %596 = vrot.lane.b32.xlu1 %v2784_v53, %s2648_s24  ;;  %v578_v56 = vpop.f32.mrb[3].mxu0 }
 0x22c   : > { %v2789_v58 = vadd.f32 %v2144_v50, %v578_v56 }
 0x22e   : > { %v2793_v59 = vpack.i.bf16 %v2789_v58, %v2787_v57 }
 0x230   : > { %2531 = vrot.lane.b32.xlu1 %v2793_v59, %s2649_s28  ;;  %2526 = vrot.lane.b32.xlu0 %v2793_v59, %s2648_s24  ;;  %s2660_s24 = smov 40  }
 0x234   : > { %839 = vrot.lane.b32.xlu1 %v2784_v53, %s2649_s28  ;;  %829 = vrot.lane.b32.xlu0 %v2787_v57, %s2652_s29  ;;  %s440_s28 = scalar_lea.vmem %s3092_s13, %s2502_s27 }
 0x238   : > { %831 = vrot.lane.b32.xlu1 %v2789_v58, %s2652_s29  ;;  %833 = vrot.lane.b32.xlu0 %v2784_v53, %s2652_s29 }
 0x29d   : > { %v597_v0 = vpop.permute.xlu1 %596 }
 0x2a2   : > { %v2527_v61 = vpop.permute.xlu0 %2526  ;;  %v2532_v6 = vpop.permute.xlu1 %2531 }
 0x2a3   : > { %v2529_v62 = vunpack.i.h.bf16 %v2527_v61  ;;  %v2528_v63 = vunpack.i.l.bf16 %v2527_v61  ;;  %v2534_v7 = vunpack.i.h.bf16 %v2532_v6  ;;  %v2533_v8 = vunpack.i.l.bf16 %v2532_v6 }
 0x2a5   : > { %v2471_v5 = vpack.c.bf16 %v2529_v62, %v2528_v63  ;;  %v2478_v9 = vpack.c.bf16 %v2534_v7, %v2533_v8 }
 0x2a6   : > { %v840_v10 = vpop.permute.xlu1 %839  ;;  %v830_v11 = vpop.permute.xlu0 %829 }
 0x2a7   : > { %2473 = vmatpush3.bf16.xpose.msk.msra.mxu1 %vm2807_vm4, %v2471_v5 }
 0x2a8   : > { %2310 = vmatprep.subr.mxu1 %v2651_v60 }
 0x2aa   : > { %v832_v12 = vpop.permute.xlu1 %831  ;;  %v834_v13 = vpop.permute.xlu0 %833 }
 0x2af   : > { %2311 = vmatpush3.xpose.msk.msra.mxu1 %vm598_vm3, %v597_v0 }
 0x2b0   : > { %2477 = vmatprep.subr.bf16.mxu1 %v2647_v51 }
 0x2b2   : > { %2313 = vmatmul.mubr.msk.f32.vlgmr.msra.gmra.mrb[0].mxu1 %vm598_vm3, %v2787_v57 }
 0x2b3   : > { %2480 = vmatpush3.bf16.xpose.msk.msra.mxu1 %vm2807_vm4, %v2478_v9  ;;  %2315 = vmatprep.mubr.msk.f32.mxu1 %vm2650_vm2, %v2651_v60 }
 0x2b4   : > { %2340 = vmatprep.subr.mxu1 %v2651_v60 }
 0x2b6   : > { %2316 = vmatmul.mubr.msk.f32.gmra.mrb[2].mxu1 %vm598_vm3, %v2789_v58 }
 0x2b7   : > { %2318 = vmatprep.mubr.msk.f32.mxu1 %vm2650_vm2, %v2651_v60 }
 0x2ba   : > { %2319 = vmatmul.mubr.msk.f32.gmra.mrb[4].mxu1 %vm598_vm3, %v2784_v53 }
 0x2bb   : > { %2341 = vmatpush3.xpose.msk.msra.mxu1 %vm598_vm3, %v840_v10  ;;  %2342 = vmatprep.mubr.msk.f32.mxu1 %vm2650_vm2, %v2651_v60 }
 0x2be   : > { %2343 = vmatmul.mubr.msk.f32.vlgmr.msra.gmra.mrb[6].mxu1 %vm598_vm3, %v830_v11 }
 0x2bf   : > { %2345 = vmatprep.mubr.msk.f32.mxu1 %vm2650_vm2, %v2651_v60 }
 0x2c2   : > { %2346 = vmatmul.mubr.msk.f32.gmra.mrb[8].mxu1 %vm598_vm3, %v832_v12 }
 0x2c3   : > { %2348 = vmatprep.mubr.msk.f32.mxu1 %vm2650_vm2, %v2651_v60 }
 0x2c6   : > { %2349 = vmatmul.mubr.msk.f32.gmra.mrb[10].mxu1 %vm598_vm3, %v834_v13 }
 0x385   : > { %v677_v14 = vpop.f32.mrb[0].mxu1 }
 0x386   : > { %v2314_v15 = vpop.f32.mrb[1].mxu1  ;;  %v692_v16 = vsel %vm691_vm5, %v677_v14, -inf }
 0x387   : > { %693 = vmax.xlane.f32.xlu1 %v692_v16 }
 0x389   : > { %v682_v17 = vpop.f32.mrb[2].mxu1 }
 0x38a   : > { %v2317_v18 = vpop.f32.mrb[3].mxu1  ;;  %v695_v19 = vsel %vm691_vm5, %v682_v17, -inf }
 0x38b   : > { %696 = vmax.xlane.f32.xlu0 %v695_v19 }
 0x38d   : > { %v687_v20 = vpop.f32.mrb[4].mxu1 }
 0x38e   : > { %v2320_v21 = vpop.f32.mrb[5].mxu1  ;;  %v699_v22 = vsel %vm698_vm6, %v687_v20, -inf }
 0x38f   : > { %700 = vmax.xlane.f32.xlu0 %v699_v22 }
 0x391   : > { %v919_v23 = vpop.f32.mrb[6].mxu1 }
 0x392   : > { %v2344_v24 = vpop.f32.mrb[7].mxu1  ;;  %v933_v25 = vsel %vm691_vm5, %v919_v23, -inf }
 0x393   : > { %934 = vmax.xlane.f32.xlu0 %v933_v25 }
 0x395   : > { %v924_v26 = vpop.f32.mrb[8].mxu1 }
 0x396   : > { %v2347_v27 = vpop.f32.mrb[9].mxu1  ;;  %v936_v28 = vsel %vm691_vm5, %v924_v26, -inf }
 0x397   : > { %937 = vmax.xlane.f32.xlu1 %v936_v28 }
 0x399   : > { %v929_v29 = vpop.f32.mrb[10].mxu1 }
 0x39a   : > { %v2350_v30 = vpop.f32.mrb[11].mxu1  ;;  %v939_v31 = vsel %vm698_vm6, %v929_v29, -inf }
 0x39b   : > { %940 = vmax.xlane.f32.xlu0 %v939_v31 }
 0x3a8   : > { %730 = vrot.lane.b32.xlu1 %v2784_v53, %s2653_s30 }
 0x3b1   : > { %2536 = vrot.lane.b32.xlu0 %v2793_v59, %s2653_s30 }
 0x414   : > { %v694_v32 = vpop.xlane.xlu1 %693 }
 0x415   : > { %v702_v33 = vsub.f32 %v677_v14, %v694_v32 }
 0x417   : > { %v705_v34 = vmul.f32 1.442695, %v702_v33 }
 0x418   : > { %v697_v35 = vpop.xlane.xlu0 %696 }
 0x419   : > { %2579 = vpow2.f32 %v705_v34  ;;  %v703_v36 = vsub.f32 %v682_v17, %v697_v35  ;;  %v828_v34 = vld [vmem:[%s3084_s5] sm:$0xf] }
 0x41a   : > { %v1133_v35 = vsel %vm1074_vm8, %v828_v34, 0 }
 0x41b   : > { %v707_v37 = vmul.f32 1.442695, %v703_v36  ;;  %v1067_v36 = vld [vmem:[%s3084_s5 + $0x4] sm:$0xf] }
 0x41c   : > { %v701_v38 = vpop.xlane.xlu0 %700  ;;  %2498 = vmatprep.subr.msk.bf16.mxu1 %vm1074_vm8, %v1067_v36 }
 0x41d   : > { %2581 = vpow2.f32 %v707_v37  ;;  %v704_v39 = vsub.f32 %v687_v20, %v701_v38  ;;  %v1076_v37 = vsel %vm1074_vm8, %v1067_v36, 0 }
 0x41e   : > { %2367 = vmatpush3.bf16.msra.mxu1 %v1076_v37 }
 0x41f   : > { %v709_v40 = vmul.f32 1.442695, %v704_v39  ;;  %2484 = vmatprep.subr.bf16.mxu1 %v2647_v51 }
 0x420   : > { %v935_v41 = vpop.xlane.xlu0 %934 }
 0x421   : > { %2583 = vpow2.f32 %v709_v40  ;;  %v942_v42 = vsub.f32 %v919_v23, %v935_v41 }
 0x423   : > { %v2580_v43 = vpop.eup %2579  ;;  %v945_v44 = vmul.f32 1.442695, %v942_v42 }
 0x424   : > { %v938_v45 = vpop.xlane.xlu1 %937  ;;  %v711_v46 = vsel %vm691_vm5, %v2580_v43, 0.0 }
 0x425   : > { %2585 = vpow2.f32 %v945_v44  ;;  %v943_v47 = vsub.f32 %v924_v26, %v938_v45  ;;  %712 = vadd.xlane.f32.xlu1 %v711_v46 }
 0x427   : > { %v2582_v48 = vpop.eup %2581  ;;  %v947_v49 = vmul.f32 1.442695, %v943_v47 }
 0x428   : > { %v941_v50 = vpop.xlane.xlu0 %940  ;;  %v714_v52 = vsel %vm691_vm5, %v2582_v48, 0.0  ;;  %v731_v9 = vpop.permute.xlu1 %730 }
 0x429   : > { %2587 = vpow2.f32 %v947_v49  ;;  %v944_v54 = vsub.f32 %v929_v29, %v941_v50  ;;  %715 = vadd.xlane.f32.xlu0 %v714_v52 }
 0x42b   : > { %v2584_v55 = vpop.eup %2583  ;;  %v949_v56 = vmul.f32 1.442695, %v944_v54 }
 0x42c   : > { %v2537_v61 = vpop.permute.xlu0 %2536  ;;  %v717_v62 = vsel %vm698_vm6, %v2584_v55, 0.0 }
 0x42d   : > { %2589 = vpow2.f32 %v949_v56  ;;  %v2539_v63 = vunpack.i.h.bf16 %v2537_v61  ;;  %v2538_v0 = vunpack.i.l.bf16 %v2537_v61  ;;  %718 = vadd.xlane.f32.xlu1 %v717_v62 }
 0x42f   : > { %v2850_v5 = vpop.eup %2585  ;;  %v2475_v6 = vpack.c.bf16 %v2539_v63, %v2538_v0 }
 0x430   : > { %v951_v7 = vsel %vm691_vm5, %v2850_v5, 0.0 }
 0x431   : > { %952 = vadd.xlane.f32.xlu0 %v951_v7  ;;  %2476 = vmatpush3.bf16.msra.mxu0 %v2475_v6 }
 0x432   : > { %2325 = vmatprep.subr.mxu0 %v2651_v60 }
 0x433   : > { %v2855_v8 = vpop.eup %2587 }
 0x434   : > { %v954_v10 = vsel %vm691_vm5, %v2855_v8, 0.0 }
 0x435   : > { %955 = vadd.xlane.f32.xlu1 %v954_v10  ;;  %2326 = vmatpush3.msk.msra.mxu0 %vm743_vm7, %v731_v9 }
 0x436   : > { %2481 = vmatprep.subr.bf16.mxu0 %v2647_v51 }
 0x437   : > { %v2590_v11 = vpop.eup %2589 }
 0x438   : > { %v957_v12 = vsel %vm698_vm6, %v2590_v11, 0.0 }
 0x439   : > { %958 = vadd.xlane.f32.xlu1 %v957_v12 }
 0x447   : > { %970 = vrot.lane.b32.xlu0 %v2784_v53, %s2654_s14 }
 0x44a   : > { %2541 = vrot.lane.b32.xlu1 %v2793_v59, %s2654_s14 }
 0x44b   : > { %1193 = vrot.lane.b32.xlu0 %v2784_v53, %s2655_s15 }
 0x44e   : > { %2546 = vrot.lane.b32.xlu1 %v2793_v59, %s2655_s15 }
 0x44f   : > { %1185 = vrot.lane.b32.xlu0 %v2789_v58, %s2656_s16 }
 0x452   : > { %1183 = vrot.lane.b32.xlu1 %v2787_v57, %s2656_s16 }
 0x453   : > { %2551 = vrot.lane.b32.xlu0 %v2793_v59, %s2657_s17 }
 0x456   : > { %1187 = vrot.lane.b32.xlu1 %v2784_v53, %s2656_s16 }
 0x457   : > { %1482 = vrot.lane.b32.xlu0 %v2787_v57, %s2658_s18 }
 0x45a   : > { %1492 = vrot.lane.b32.xlu1 %v2784_v53, %s2657_s17 }
 0x45b   : > { %1486 = vrot.lane.b32.xlu0 %v2784_v53, %s2658_s18 }
 0x45e   : > { %1484 = vrot.lane.b32.xlu1 %v2789_v58, %s2658_s18 }
 0x4b2   : > { %v713_v13 = vpop.xlane.xlu1 %712 }
 0x4b3   : > { %2591 = vrcp.f32 %v713_v13 }
 0x4b6   : > { %v716_v14 = vpop.xlane.xlu0 %715 }
 0x4b7   : > { %2593 = vrcp.f32 %v716_v14 }
 0x4ba   : > { %v719_v15 = vpop.xlane.xlu1 %718 }
 0x4bb   : > { %2595 = vrcp.f32 %v719_v15 }
 0x4bd   : > { %v2592_v16 = vpop.eup %2591 }
 0x4be   : > { %v723_v17 = vmul.f32 %v2592_v16, %v2580_v43  ;;  %v953_v57 = vpop.xlane.xlu0 %952 }
 0x4bf   : > { %2597 = vrcp.f32 %v953_v57 }
 0x4c0   : > { %2328 = vmatmul.mubr.msk.f32.vlgmr.msra.gmra.mrb[4].mxu0 %vm691_vm5, %v723_v17 }
 0x4c1   : > { %v2594_v18 = vpop.eup %2593  ;;  %2330 = vmatprep.mubr.msk.f32.mxu0 %vm2650_vm2, %v2651_v60 }
 0x4c2   : > { %v956_v19 = vpop.xlane.xlu1 %955  ;;  %v724_v20 = vmul.f32 %v2594_v18, %v2582_v48  ;;  %v971_v29 = vpop.permute.xlu0 %970 }
 0x4c3   : > { %2599 = vrcp.f32 %v956_v19 }
 0x4c4   : > { %2331 = vmatmul.mubr.msk.f32.gmra.mrb[6].mxu0 %vm691_vm5, %v724_v20 }
 0x4c5   : > { %v2596_v58 = vpop.eup %2595  ;;  %2333 = vmatprep.mubr.msk.f32.mxu0 %vm2650_vm2, %v2651_v60 }
 0x4c6   : > { %v959_v21 = vpop.xlane.xlu1 %958  ;;  %v725_v22 = vmul.f32 %v2596_v58, %v2584_v55  ;;  %v1194_v48 = vpop.permute.xlu0 %1193 }
 0x4c7   : > { %2601 = vrcp.f32 %v959_v21 }
 0x4c8   : > { %2334 = vmatmul.mubr.msk.f32.gmra.mrb[8].mxu0 %vm691_vm5, %v725_v22 }
 0x4c9   : > { %2357 = vmatprep.mubr.msk.f32.mxu0 %vm2650_vm2, %v2651_v60  ;;  %v2598_v27 = vpop.eup %2597 }
 0x4ca   : > { %v2542_v23 = vpop.permute.xlu1 %2541  ;;  %v963_v28 = vmul.f32 %v2598_v27, %v2850_v5  ;;  %v1186_v62 = vpop.permute.xlu0 %1185 }
 0x4cb   : > { %v2544_v24 = vunpack.i.h.bf16 %v2542_v23  ;;  %v2543_v25 = vunpack.i.l.bf16 %v2542_v23 }
 0x4cd   : > { %v2482_v26 = vpack.c.bf16 %v2544_v24, %v2543_v25  ;;  %v2600_v30 = vpop.eup %2599 }
 0x4ce   : > { %v964_v31 = vmul.f32 %v2600_v30, %v2855_v8  ;;  %v2547_v49 = vpop.permute.xlu1 %2546  ;;  %v2552_v6 = vpop.permute.xlu0 %2551 }
 0x4cf   : > { %2483 = vmatpush3.bf16.msra.mxu0 %v2482_v26  ;;  %v2549_v55 = vunpack.i.h.bf16 %v2547_v49  ;;  %v2548_v56 = vunpack.i.l.bf16 %v2547_v49  ;;  %v2554_v7 = vunpack.i.h.bf16 %v2552_v6  ;;  %v2553_v8 = vunpack.i.l.bf16 %v2552_v6 }
 0x4d0   : > { %2355 = vmatprep.subr.mxu0 %v2651_v60 }
 0x4d1   : > { %v2602_v32 = vpop.eup %2601  ;;  %v2485_v5 = vpack.c.bf16 %v2549_v55, %v2548_v56  ;;  %v2492_v10 = vpack.c.bf16 %v2554_v7, %v2553_v8 }
 0x4d2   : > { %v965_v33 = vmul.f32 %v2602_v32, %v2590_v11  ;;  %v1184_v9 = vpop.permute.xlu1 %1183  ;;  %v1483_v1 = vpop.permute.xlu0 %1482 }
 0x4d3   : > { %2356 = vmatpush3.msk.msra.mxu0 %vm743_vm7, %v971_v29 }
 0x4d4   : > { %2358 = vmatmul.mubr.msk.f32.vlgmr.msra.gmra.mrb[10].mxu0 %vm691_vm5, %v963_v28  ;;  %2499 = vmatprep.subr.msk.bf16.mxu0 %vm1074_vm8, %v828_v34 }
 0x4d5   : > { %2360 = vmatprep.mubr.msk.f32.mxu0 %vm2650_vm2, %v2651_v60  ;;  %2373 = vmatpush3.bf16.msra.mxu0 %v1133_v35 }
 0x4d6   : > { %2488 = vmatprep.subr.bf16.mxu0 %v2647_v51  ;;  %v1188_v11 = vpop.permute.xlu1 %1187  ;;  %v1487_v14 = vpop.permute.xlu0 %1486 }
 0x4d8   : > { %2361 = vmatmul.mubr.msk.f32.gmra.mrb[12].mxu0 %vm691_vm5, %v964_v31 }
 0x4d9   : > { %2363 = vmatprep.mubr.msk.f32.mxu0 %vm2650_vm2, %v2651_v60 }
 0x4da   : > { %v1493_v12 = vpop.permute.xlu1 %1492 }
 0x4dc   : > { %2364 = vmatmul.mubr.msk.f32.gmra.mrb[14].mxu0 %vm691_vm5, %v965_v33 }
 0x4de   : > { %v1485_v13 = vpop.permute.xlu1 %1484 }
 0x593   : > { %v812_v38 = vpop.f32.mrb[4].mxu0 }
 0x594   : > { %v2329_v39 = vpop.f32.mrb[5].mxu0 }
 0x597   : > { %v817_v40 = vpop.f32.mrb[6].mxu0 }
 0x598   : > { %v826_v41 = vpack.c.bf16 %v817_v40, %v812_v38  ;;  %v2332_v42 = vpop.f32.mrb[7].mxu0 }
 0x59a   : > { %2374 = vmatprep.mubr.msk.bf16.mxu0 %vm598_vm3, %v826_v41 }
 0x59b   : > { %v822_v43 = vpop.f32.mrb[8].mxu0 }
 0x59c   : > { %v827_v44 = vpack.c.bf16 %v822_v43, %v822_v43  ;;  %v2335_v45 = vpop.f32.mrb[9].mxu0 }
 0x59e   : > { %2375 = vmatmul.mubr.msk.bf16.vlgmr.msra.gmra.mrb[16].mxu0 %vm598_vm3, %v827_v44 }
 0x59f   : > { %2399 = vmatprep.mubr.msk.f32.mxu0 %vm2650_vm2, %v2651_v60 }
 0x5a7   : > { %v1051_v46 = vpop.f32.mrb[10].mxu0 }
 0x5a8   : > { %v2359_v47 = vpop.f32.mrb[11].mxu0 }
 0x5ab   : > { %v1056_v50 = vpop.f32.mrb[12].mxu0 }
 0x5ac   : > { %v1065_v52 = vpack.c.bf16 %v1056_v50, %v1051_v46  ;;  %v2362_v54 = vpop.f32.mrb[13].mxu0 }
 0x5ae   : > { %2368 = vmatprep.mubr.msk.bf16.mxu1 %vm598_vm3, %v1065_v52 }
 0x5af   : > { %v1061_v61 = vpop.f32.mrb[14].mxu0 }
 0x5b0   : > { %v1066_v63 = vpack.c.bf16 %v1061_v61, %v1061_v61  ;;  %v2365_v0 = vpop.f32.mrb[15].mxu0 }
 0x5b2   : > { %2369 = vmatmul.mubr.msk.bf16.vlgmr.msra.gmra.mrb[12].mxu1 %vm598_vm3, %v1066_v63 }
 0x5b3   : > { %2487 = vmatpush3.bf16.xpose.msk.msra.mxu1 %vm2807_vm4, %v2485_v5  ;;  %2384 = vmatprep.mubr.msk.f32.mxu1 %vm2650_vm2, %v2651_v60 }
 0x5b4   : > { %2382 = vmatprep.subr.mxu1 %v2651_v60 }
 0x5bb   : > { %2383 = vmatpush3.xpose.msk.msra.mxu1 %vm598_vm3, %v1194_v48 }
 0x5bc   : > { %2491 = vmatprep.subr.bf16.mxu1 %v2647_v51 }
 0x5be   : > { %2385 = vmatmul.mubr.msk.f32.vlgmr.msra.gmra.mrb[16].mxu1 %vm598_vm3, %v1184_v9 }
 0x5bf   : > { %2494 = vmatpush3.bf16.xpose.msk.msra.mxu1 %vm2807_vm4, %v2492_v10  ;;  %2387 = vmatprep.mubr.msk.f32.mxu1 %vm2650_vm2, %v2651_v60 }
 0x5c0   : > { %2418 = vmatprep.subr.mxu1 %v2651_v60 }
 0x5c2   : > { %2388 = vmatmul.mubr.msk.f32.gmra.mrb[18].mxu1 %vm598_vm3, %v1186_v62 }
 0x5c3   : > { %2390 = vmatprep.mubr.msk.f32.mxu1 %vm2650_vm2, %v2651_v60 }
 0x5c6   : > { %2391 = vmatmul.mubr.msk.f32.gmra.mrb[20].mxu1 %vm598_vm3, %v1188_v11 }
 0x5c7   : > { %2419 = vmatpush3.xpose.msk.msra.mxu1 %vm598_vm3, %v1493_v12  ;;  %2420 = vmatprep.mubr.msk.f32.mxu1 %vm2650_vm2, %v2651_v60 }
 0x5ca   : > { %2421 = vmatmul.mubr.msk.f32.vlgmr.msra.gmra.mrb[22].mxu1 %vm598_vm3, %v1483_v1 }
 0x5cb   : > { %2423 = vmatprep.mubr.msk.f32.mxu1 %vm2650_vm2, %v2651_v60 }
 0x5ce   : > { %2424 = vmatmul.mubr.msk.f32.gmra.mrb[24].mxu1 %vm598_vm3, %v1485_v13 }
 0x5cf   : > { %2426 = vmatprep.mubr.msk.f32.mxu1 %vm2650_vm2, %v2651_v60 }
 0x5d2   : > { %2427 = vmatmul.mubr.msk.f32.gmra.mrb[26].mxu1 %vm598_vm3, %v1487_v14 }
 0x671   : > { %v2376_v15 = vpop.f32.mrb[16].mxu0 }
 0x672   : > { %v1169_v16 = vpop.f32.mrb[17].mxu0 }
 0x673   : > { %v2377_v17 = vpop.f32.mrb[18].mxu0 }
 0x674   : > { %v1172_v18 = vpop.f32.mrb[19].mxu0 }
 0x685   : > { %v2370_v57 = vpop.f32.mrb[12].mxu1 }
 0x686   : > { %v2939_v19 = vadd.f32 %v2376_v15, %v2370_v57  ;;  %v1112_v20 = vpop.f32.mrb[13].mxu1 }
 0x687   : > { %v2941_v58 = vadd.f32 %v1169_v16, %v1112_v20  ;;  %v2371_v21 = vpop.f32.mrb[14].mxu1 }
 0x688   : > { %v1115_v22 = vpop.f32.mrb[15].mxu1 }
 0x689   : > { %v2943_v23 = vadd.f32 %v1172_v18, %v1115_v22 }
 0x691   : > { %v1273_v24 = vpop.f32.mrb[16].mxu1 }
 0x692   : > { %v2386_v25 = vpop.f32.mrb[17].mxu1  ;;  %v1287_v26 = vsel %vm691_vm5, %v1273_v24, -inf }
 0x693   : > { %1288 = vmax.xlane.f32.xlu1 %v1287_v26 }
 0x695   : > { %v1278_v27 = vpop.f32.mrb[18].mxu1 }
 0x696   : > { %v2389_v28 = vpop.f32.mrb[19].mxu1  ;;  %v1290_v29 = vsel %vm691_vm5, %v1278_v27, -inf }
 0x697   : > { %1291 = vmax.xlane.f32.xlu0 %v1290_v29 }
 0x699   : > { %v1283_v30 = vpop.f32.mrb[20].mxu1 }
 0x69a   : > { %v2392_v31 = vpop.f32.mrb[21].mxu1  ;;  %v1293_v32 = vsel %vm698_vm6, %v1283_v30, -inf }
 0x69b   : > { %1294 = vmax.xlane.f32.xlu0 %v1293_v32  ;;  %v1421_v32 = vld [vmem:[%s3084_s5 + $0x8] sm:$0xf] }
 0x69d   : > { %v2948_v33 = vpop.f32.mrb[22].mxu1 }
 0x69e   : > { %v2422_v34 = vpop.f32.mrb[23].mxu1  ;;  %v1586_v56 = vsel %vm691_vm5, %v2948_v33, -inf }
 0x6a1   : > { %v2950_v35 = vpop.f32.mrb[24].mxu1 }
 0x6a2   : > { %v2425_v36 = vpop.f32.mrb[25].mxu1  ;;  %v1589_v61 = vsel %vm691_vm5, %v2950_v35, -inf }
 0x6a5   : > { %v2952_v37 = vpop.f32.mrb[26].mxu1 }
 0x6a6   : > { %v2428_v38 = vpop.f32.mrb[27].mxu1  ;;  %v1592_v62 = vsel %vm698_vm6, %v2952_v37, -inf }
 0x720   : > { %v1289_v39 = vpop.xlane.xlu1 %1288 }
 0x721   : > { %v1296_v40 = vsub.f32 %v1273_v24, %v1289_v39 }
 0x723   : > { %v1299_v41 = vmul.f32 1.442695, %v1296_v40 }
 0x724   : > { %v1292_v42 = vpop.xlane.xlu0 %1291 }
 0x725   : > { %2603 = vpow2.f32 %v1299_v41  ;;  %v1297_v43 = vsub.f32 %v1278_v27, %v1292_v42 }
 0x727   : > { %v1301_v44 = vmul.f32 1.442695, %v1297_v43 }
 0x728   : > { %v1295_v45 = vpop.xlane.xlu0 %1294 }
 0x729   : > { %2605 = vpow2.f32 %v1301_v44  ;;  %v1298_v46 = vsub.f32 %v1283_v30, %v1295_v45 }
 0x72b   : > { %v1303_v47 = vmul.f32 1.442695, %v1298_v46 }
 0x72d   : > { %2607 = vpow2.f32 %v1303_v47 }
 0x72f   : > { %v2604_v48 = vpop.eup %2603 }
 0x730   : > { %v1305_v49 = vsel %vm691_vm5, %v2604_v48, 0.0 }
 0x731   : > { %1306 = vadd.xlane.f32.xlu0 %v1305_v49 }
 0x733   : > { %v2606_v50 = vpop.eup %2605 }
 0x734   : > { %v1308_v52 = vsel %vm691_vm5, %v2606_v50, 0.0 }
 0x735   : > { %1309 = vadd.xlane.f32.xlu1 %v1308_v52 }
 0x737   : > { %v2608_v54 = vpop.eup %2607 }
 0x738   : > { %v1311_v55 = vsel %vm698_vm6, %v2608_v54, 0.0 }
 0x739   : > { %1312 = vadd.xlane.f32.xlu0 %v1311_v55  ;;  %v1720_v55 = vld [vmem:[%s3084_s5 + $0xc] sm:$0xf] }
 0x73a   : > { %2501 = vmatprep.subr.msk.bf16.mxu1 %vm1074_vm8, %v1720_v55 }
 0x746   : > { %2556 = vrot.lane.b32.xlu1 %v2793_v59, %s2659_s23 }
 0x74f   : > { %1324 = vrot.lane.b32.xlu0 %v2784_v53, %s2659_s23 }
 0x76a   : > { %1587 = vmax.xlane.f32.xlu1 %v1586_v56  ;;  %v1728_v56 = vsel %vm1074_vm8, %v1720_v55, 0 }
 0x76b   : > { %2445 = vmatpush3.bf16.msra.mxu1 %v1728_v56 }
 0x76e   : > { %1590 = vmax.xlane.f32.xlu0 %v1589_v61  ;;  %1593 = vmax.xlane.f32.xlu1 %v1592_v62 }
 0x7be   : > { %v1307_v63 = vpop.xlane.xlu0 %1306 }
 0x7bf   : > { %2609 = vrcp.f32 %v1307_v63 }
 0x7c2   : > { %v1310_v0 = vpop.xlane.xlu1 %1309 }
 0x7c3   : > { %2611 = vrcp.f32 %v1310_v0 }
 0x7c6   : > { %v2557_v5 = vpop.permute.xlu1 %2556  ;;  %v1313_v6 = vpop.xlane.xlu0 %1312 }
 0x7c7   : > { %v2559_v7 = vunpack.i.h.bf16 %v2557_v5  ;;  %v2558_v8 = vunpack.i.l.bf16 %v2557_v5  ;;  %2613 = vrcp.f32 %v1313_v6 }
 0x7c9   : > { %v2489_v9 = vpack.c.bf16 %v2559_v7, %v2558_v8  ;;  %v2610_v10 = vpop.eup %2609 }
 0x7ca   : > { %v1317_v11 = vmul.f32 %v2610_v10, %v2604_v48  ;;  %v1325_v12 = vpop.permute.xlu0 %1324 }
 0x7cb   : > { %2490 = vmatpush3.bf16.msra.mxu0 %v2489_v9 }
 0x7cc   : > { %2397 = vmatprep.subr.mxu0 %v2651_v60 }
 0x7cd   : > { %v2612_v1 = vpop.eup %2611 }
 0x7ce   : > { %v1318_v13 = vmul.f32 %v2612_v1, %v2606_v50 }
 0x7cf   : > { %2398 = vmatpush3.msk.msra.mxu0 %vm743_vm7, %v1325_v12 }
 0x7d0   : > { %2400 = vmatmul.mubr.msk.f32.vlgmr.msra.gmra.mrb[20].mxu0 %vm691_vm5, %v1317_v11  ;;  %2500 = vmatprep.subr.msk.bf16.mxu0 %vm1074_vm8, %v1421_v32 }
 0x7d1   : > { %2402 = vmatprep.mubr.msk.f32.mxu0 %vm2650_vm2, %v2651_v60  ;;  %v2614_v14 = vpop.eup %2613 }
 0x7d2   : > { %v1319_v15 = vmul.f32 %v2614_v14, %v2608_v54 }
 0x7d4   : > { %2403 = vmatmul.mubr.msk.f32.gmra.mrb[22].mxu0 %vm691_vm5, %v1318_v13 }
 0x7d5   : > { %2405 = vmatprep.mubr.msk.f32.mxu0 %vm2650_vm2, %v2651_v60 }
 0x7d8   : > { %2406 = vmatmul.mubr.msk.f32.gmra.mrb[24].mxu0 %vm691_vm5, %v1319_v15 }
 0x7f7   : > { %v1588_v16 = vpop.xlane.xlu1 %1587 }
 0x7f8   : > { %v1595_v17 = vsub.f32 %v2948_v33, %v1588_v16  ;;  %v1429_v33 = vsel %vm1074_vm8, %v1421_v32, 0 }
 0x7f9   : > { %2409 = vmatpush3.bf16.msra.mxu0 %v1429_v33 }
 0x7fa   : > { %v1598_v18 = vmul.f32 1.442695, %v1595_v17  ;;  %2495 = vmatprep.subr.bf16.mxu0 %v2647_v51 }
 0x7fb   : > { %v1591_v57 = vpop.xlane.xlu0 %1590  ;;  %v1594_v20 = vpop.xlane.xlu1 %1593 }
 0x7fc   : > { %2615 = vpow2.f32 %v1598_v18  ;;  %v1596_v21 = vsub.f32 %v2950_v35, %v1591_v57  ;;  %v1597_v22 = vsub.f32 %v2952_v37, %v1594_v20 }
 0x7fe   : > { %v1600_v24 = vmul.f32 1.442695, %v1596_v21  ;;  %v1602_v25 = vmul.f32 1.442695, %v1597_v22 }
 0x800   : > { %2617 = vpow2.f32 %v1600_v24 }
 0x801   : > { %2619 = vpow2.f32 %v1602_v25 }
 0x806   : > { %v2616_v26 = vpop.eup %2615 }
 0x807   : > { %v1604_v27 = vsel %vm691_vm5, %v2616_v26, 0.0 }
 0x808   : > { %1605 = vadd.xlane.f32.xlu0 %v1604_v27 }
 0x80a   : > { %v2618_v28 = vpop.eup %2617 }
 0x80b   : > { %v2620_v29 = vpop.eup %2619  ;;  %v1607_v30 = vsel %vm691_vm5, %v2618_v28, 0.0 }
 0x80c   : > { %1608 = vadd.xlane.f32.xlu1 %v1607_v30  ;;  %v1610_v31 = vsel %vm698_vm6, %v2620_v29, 0.0 }
 0x80d   : > { %1611 = vadd.xlane.f32.xlu0 %v1610_v31 }
 0x81d   : > { %2561 = vrot.lane.b32.xlu1 %v2793_v59, %s2660_s24 }
 0x823   : > { %1623 = vrot.lane.b32.xlu0 %v2784_v53, %s2660_s24 }
 0x895   : > { %v1606_v36 = vpop.xlane.xlu0 %1605 }
 0x896   : > { %2621 = vrcp.f32 %v1606_v36 }
 0x899   : > { %v1609_v34 = vpop.xlane.xlu1 %1608 }
 0x89a   : > { %2623 = vrcp.f32 %v1609_v34  ;;  %v1612_v43 = vpop.xlane.xlu0 %1611 }
 0x89b   : > { %2625 = vrcp.f32 %v1612_v43 }
 0x89d   : > { %v2562_v38 = vpop.permute.xlu1 %2561 }
 0x89e   : > { %v2564_v40 = vunpack.i.h.bf16 %v2562_v38  ;;  %v2563_v41 = vunpack.i.l.bf16 %v2562_v38  ;;  %v1624_v47 = vpop.permute.xlu0 %1623 }
 0x8a0   : > { %v2496_v46 = vpack.c.bf16 %v2564_v40, %v2563_v41  ;;  %v2622_v51 = vpop.eup %2621  ;;  %v2568_v40 = vld [vmem:[%s3088_s9 + $0x8] sm:$0xff]  }
 0x8a1   : > { %v1616_v48 = vmul.f32 %v2622_v51, %v2616_v26 }
 0x8a3   : > { %v1405_v35 = vpop.f32.mrb[20].mxu0 }
 0x8a4   : > { %v2401_v37 = vpop.f32.mrb[21].mxu0  ;;  %v2624_v49 = vpop.eup %2623 }
 0x8a5   : > { %v1617_v50 = vmul.f32 %v2624_v49, %v2618_v28  ;;  %v2626_v52 = vpop.eup %2625 }
 0x8a6   : > { %v1618_v54 = vmul.f32 %v2626_v52, %v2620_v29 }
 0x8a7   : > { %v1410_v59 = vpop.f32.mrb[22].mxu0 }
 0x8a8   : > { %v1419_v39 = vpack.c.bf16 %v1410_v59, %v1405_v35  ;;  %v2404_v53 = vpop.f32.mrb[23].mxu0 }
 0x8a9   : > { %v2567_v53 = vld [vmem:[%s3088_s9] sm:$0xff]  }
 0x8aa   : > { %2410 = vmatprep.mubr.msk.bf16.mxu0 %vm598_vm3, %v1419_v39 }
 0x8ab   : > { %v1415_v42 = vpop.f32.mrb[24].mxu0 }
 0x8ac   : > { %v1420_v44 = vpack.c.bf16 %v1415_v42, %v1415_v42  ;;  %v2407_v45 = vpop.f32.mrb[25].mxu0 }
 0x8ae   : > { %2411 = vmatmul.mubr.msk.bf16.vlgmr.msra.gmra.mrb[28].mxu0 %vm598_vm3, %v1420_v44 }
 0x8af   : > { %2497 = vmatpush3.bf16.msra.mxu0 %v2496_v46  ;;  %2435 = vmatprep.mubr.msk.f32.mxu0 %vm2650_vm2, %v2651_v60 }
 0x8b0   : > { %2433 = vmatprep.subr.mxu0 %v2651_v60 }
 0x8b3   : > { %2434 = vmatpush3.msk.msra.mxu0 %vm743_vm7, %v1624_v47 }
 0x8b4   : > { %2450 = vmatprep.subr.bf16.mxu0 %v2567_v53 }
 0x8b6   : > { %2436 = vmatmul.mubr.msk.f32.vlgmr.msra.gmra.mrb[26].mxu0 %vm691_vm5, %v1616_v48 }
 0x8b7   : > { %2438 = vmatprep.mubr.msk.f32.mxu0 %vm2650_vm2, %v2651_v60  ;;  %2451 = vmatpush3.bf16.msra.mxu0 %v2567_v53 }
 0x8b8   : > { %2452 = vmatprep.subr.bf16.mxu0 %v2568_v40 }
 0x8ba   : > { %2439 = vmatmul.mubr.msk.f32.gmra.mrb[32].mxu0 %vm691_vm5, %v1617_v50  ;;  %v2198_v50 = vld [vmem:[%s3086_s7] ss:$0 sm:$0xff] }
 0x8bb   : > { %2441 = vmatprep.mubr.msk.f32.mxu0 %vm2650_vm2, %v2651_v60  ;;  %2453 = vmatpush3.bf16.msra.mxu0 %v2568_v40 }
 0x8be   : > { %2442 = vmatmul.mubr.msk.f32.gmra.mrb[34].mxu0 %vm691_vm5, %v1618_v54 }
 0x981   : > { %v2412_v61 = vpop.f32.mrb[28].mxu0 }
 0x982   : > { %v1481_v62 = vadd.f32 %v2412_v61, %v2939_v19  ;;  %v1465_v63 = vpop.f32.mrb[29].mxu0 }
 0x983   : > { %v1479_v0 = vadd.f32 %v1465_v63, %v2941_v58  ;;  %v2413_v5 = vpop.f32.mrb[30].mxu0 }
 0x984   : > { %v1468_v60 = vpop.f32.mrb[31].mxu0 }
 0x985   : > { %v1480_v6 = vadd.f32 %v1468_v60, %v2943_v23  ;;  %v2197_v23 = vld [vmem:[%s3085_s6] ss:$0 sm:$0xff] }
 0x989   : > { %v1704_v7 = vpop.f32.mrb[26].mxu0 }
 0x98a   : > { %v2437_v8 = vpop.f32.mrb[27].mxu0 }
 0x98d   : > { %v1709_v9 = vpop.f32.mrb[32].mxu0 }
 0x98e   : > { %v1718_v10 = vpack.c.bf16 %v1709_v9, %v1704_v7  ;;  %v2440_v11 = vpop.f32.mrb[33].mxu0 }
 0x98f   : > { %v2570_v11 = vld [vmem:[%s3090_s11 + $0x8] sm:$0xff]  }
 0x990   : > { %2446 = vmatprep.mubr.msk.bf16.mxu1 %vm598_vm3, %v1718_v10  ;;  %v2569_v10 = vld [vmem:[%s3090_s11] sm:$0xff]  }
 0x991   : > { %v1714_v12 = vpop.f32.mrb[34].mxu0  ;;  %2458 = vmatprep.subr.bf16.mxu1 %v2569_v10 }
 0x992   : > { %v1719_v1 = vpack.c.bf16 %v1714_v12, %v1714_v12  ;;  %v2443_v13 = vpop.f32.mrb[35].mxu0  ;;  %v2571_v12 = vld [vmem:[%s3090_s11 + $0x10] sm:$0xff]  }
 0x993   : > { %v2200_v13 = vld [vmem:[%s3089_s10] ss:$0 sm:$0xff] }
 0x994   : > { %2447 = vmatmul.mubr.msk.bf16.vlgmr.msra.gmra.mrb[28].mxu1 %vm598_vm3, %v1719_v1  ;;  %v2572_v1 = vld [vmem:[%s3090_s11 + $0x18] sm:$0xff]  }
 0x995   : > { %2459 = vmatpush3.bf16.msra.mxu1 %v2569_v10 }
 0x996   : > { %2460 = vmatprep.subr.bf16.mxu1 %v2570_v11 }
 0x999   : > { %2461 = vmatpush3.bf16.msra.mxu1 %v2570_v11 }
 0x99a   : > { %2462 = vmatprep.subr.bf16.mxu1 %v2571_v12 }
 0x99d   : > { %2463 = vmatpush3.bf16.msra.mxu1 %v2571_v12 }
 0x99e   : > { %2464 = vmatprep.subr.bf16.mxu1 %v2572_v1 }
 0x9a1   : > { %2465 = vmatpush3.bf16.msra.mxu1 %v2572_v1 }
 0xa67   : > { %v2448_v19 = vpop.f32.mrb[28].mxu1 }
 0xa68   : > { %v1780_v14 = vadd.f32 %v2448_v19, %v1481_v62  ;;  %v1764_v15 = vpop.f32.mrb[29].mxu1  ;;  %v2199_v62 = vld [vmem:[%s3087_s8] ss:$0 sm:$0xff] }
 0xa69   : > { %v1778_v58 = vadd.f32 %v1764_v15, %v1479_v0  ;;  %v2449_v16 = vpop.f32.mrb[30].mxu1 }
 0xa6a   : > { %v1767_v17 = vpop.f32.mrb[31].mxu1  ;;  %v1783_v18 = vadd.f32 %v1780_v14, %v2749_v3 }
 0xa6b   : > { %v1781_v57 = vadd.f32 %v2747_v2, %v1778_v58  ;;  %v1779_v20 = vadd.f32 %v1767_v17, %v1480_v6 }
 0xa6c   : > { %v3019_v24 = vadd.f32 %v2197_v23, %v1783_v18 }
 0xa6d   : > { %v3016_v21 = vadd.f32 %v2197_v23, %v1781_v57  ;;  %v1782_v22 = vadd.f32 %v2751_v4, %v1779_v20 }
 0xa6e   : > { %v1802_v2 = vsel %vm457_vm1, %v3019_v24, 0.0 }
 0xa6f   : > { %v3021_v25 = vadd.f32 %v2197_v23, %v1782_v22  ;;  %v1796_v26 = vsel %vm450_vm0, %v3016_v21, 0.0 }
 0xa70   : > { %1797 = vadd.xlane.f32.xlu1 %v1796_v26 }
 0xa71   : > { %v1799_v27 = vsel %vm450_vm0, %v3021_v25, 0.0 }
 0xa72   : > { %1800 = vadd.xlane.f32.xlu0 %v1799_v27 }
 0xa74   : > { %1803 = vadd.xlane.f32.xlu1 %v1802_v2 }
 0xafd   : > { %v1798_v3 = vpop.xlane.xlu1 %1797 }
 0xafe   : > { %v1805_v28 = vmul.f32 0.03125, %v1798_v3 }
 0xaff   : > { %v1801_v29 = vpop.xlane.xlu0 %1800 }
 0xb00   : > { %v1808_v4 = vsub.f32 %v3016_v21, %v1805_v28  ;;  %v1806_v30 = vmul.f32 0.03125, %v1801_v29 }
 0xb01   : > { %v1804_v31 = vpop.xlane.xlu1 %1803 }
 0xb02   : > { %v1809_v32 = vsub.f32 %v3021_v25, %v1806_v30  ;;  %v1807_v33 = vmul.f32 0.03125, %v1804_v31  ;;  %v1811_v34 = vmul.f32 %v1808_v4, %v1808_v4 }
 0xb04   : > { %v1810_v35 = vsub.f32 %v3019_v24, %v1807_v33  ;;  %v1814_v36 = vsel %vm450_vm0, %v1811_v34, 0.0  ;;  %v1812_v37 = vmul.f32 %v1809_v32, %v1809_v32 }
 0xb05   : > { %1815 = vadd.xlane.f32.xlu0 %v1814_v36 }
 0xb06   : > { %v1817_v38 = vsel %vm450_vm0, %v1812_v37, 0.0  ;;  %v1813_v59 = vmul.f32 %v1810_v35, %v1810_v35 }
 0xb07   : > { %1818 = vadd.xlane.f32.xlu1 %v1817_v38 }
 0xb08   : > { %v1820_v39 = vsel %vm457_vm1, %v1813_v59, 0.0 }
 0xb09   : > { %1821 = vadd.xlane.f32.xlu0 %v1820_v39 }
 0xb92   : > { %v1816_v41 = vpop.xlane.xlu0 %1815 }
 0xb93   : > { %v1823_v42 = vmul.f32 0.03125, %v1816_v41 }
 0xb94   : > { %v1819_v43 = vpop.xlane.xlu1 %1818 }
 0xb95   : > { %v1826_v44 = vadd.f32 1e-12, %v1823_v42  ;;  %v1824_v45 = vmul.f32 0.03125, %v1819_v43 }
 0xb96   : > { %v1822_v46 = vpop.xlane.xlu0 %1821 }
 0xb97   : > { %2627 = vrsqrt.f32 %v1826_v44  ;;  %v1827_v51 = vadd.f32 1e-12, %v1824_v45  ;;  %v1825_v47 = vmul.f32 0.03125, %v1822_v46  ;;  %v2205_v46 = vld [vmem:[%s3091_s12] ss:$0 sm:$0xff] }
 0xb99   : > { %2629 = vrsqrt.f32 %v1827_v51  ;;  %v1828_v48 = vadd.f32 1e-12, %v1825_v47 }
 0xb9b   : > { %2631 = vrsqrt.f32 %v1828_v48 }
 0xba1   : > { %v2628_v49 = vpop.eup %2627 }
 0xba2   : > { %v1832_v52 = vmul.f32 %v2628_v49, %v1808_v4 }
 0xba3   : > { %v2630_v54 = vpop.eup %2629 }
 0xba4   : > { %v1833_v55 = vmul.f32 %v2630_v54, %v1809_v32  ;;  %v1841_v56 = vmul.f32 %v2198_v50, %v1832_v52 }
 0xba5   : > { %v2632_v61 = vpop.eup %2631 }
 0xba6   : > { %v1834_v63 = vmul.f32 %v2632_v61, %v1810_v35  ;;  %v1842_v0 = vmul.f32 %v2198_v50, %v1833_v55  ;;  %v1850_v60 = vadd.f32 %v2199_v62, %v1841_v56  ;;  %v2077_v55 = vld [vmem:[%s440_s28 + $0x8] sm:$0x1] }
 0xba8   : > { %v1843_v5 = vmul.f32 %v2198_v50, %v1834_v63  ;;  %v1851_v6 = vadd.f32 %v2199_v62, %v1842_v0 }
 0xbaa   : > { %v1852_v7 = vadd.f32 %v2199_v62, %v1843_v5  ;;  %v1853_v8 = vpack.c.bf16 %v1851_v6, %v1850_v60 }
 0xbac   : > { %v1854_v9 = vpack.c.bf16 %v1852_v7, %v1852_v7  ;;  %2454 = vmatprep.mubr.msk.bf16.mxu0 %vm450_vm0, %v1853_v8 }
 0xbae   : > { %2455 = vmatmul.mubr.msk.bf16.vlgmr.msra.gmra.mrb[36].mxu0 %vm450_vm0, %v1854_v9 }
 0xc81   : > { %v2456_v19 = vpop.f32.mrb[36].mxu0 }
 0xc82   : > { %v1927_v14 = vadd.f32 %v2456_v19, %v2200_v13  ;;  %v1918_v15 = vpop.f32.mrb[37].mxu0 }
 0xc83   : > { %v1919_v58 = vadd.f32 %v2200_v13, %v1918_v15  ;;  %v2457_v16 = vpop.f32.mrb[38].mxu0 }
 0xc84   : > { %v1934_v23 = vmul.f32 %v1927_v14, %v1927_v14  ;;  %v1921_v17 = vpop.f32.mrb[39].mxu0 }
 0xc85   : > { %v1932_v18 = vmul.f32 %v1919_v58, %v1919_v58  ;;  %v1922_v57 = vadd.f32 %v2200_v13, %v1921_v17 }
 0xc86   : > { %v1937_v20 = vmul.f32 %v1934_v23, %v1927_v14 }
 0xc87   : > { %v1935_v22 = vmul.f32 %v1932_v18, %v1919_v58  ;;  %v1933_v26 = vmul.f32 %v1922_v57, %v1922_v57 }
 0xc88   : > { %v1940_v27 = vmul.f32 0.044715, %v1937_v20 }
 0xc89   : > { %v1938_v2 = vmul.f32 0.044715, %v1935_v22  ;;  %v1936_v3 = vmul.f32 %v1933_v26, %v1922_v57 }
 0xc8a   : > { %v1943_v28 = vadd.f32 %v1940_v27, %v1927_v14 }
 0xc8b   : > { %v1941_v29 = vadd.f32 %v1938_v2, %v1919_v58  ;;  %v1939_v4 = vmul.f32 0.044715, %v1936_v3 }
 0xc8c   : > { %v1946_v30 = vmul.f32 0.7978846, %v1943_v28 }
 0xc8d   : > { %v1944_v31 = vmul.f32 0.7978846, %v1941_v29  ;;  %v1942_v32 = vadd.f32 %v1939_v4, %v1922_v57 }
 0xc8e   : > { %2633 = vtanh.f32 %v1946_v30 }
 0xc8f   : > { %2635 = vtanh.f32 %v1944_v31  ;;  %v1945_v33 = vmul.f32 0.7978846, %v1942_v32 }
 0xc91   : > { %2637 = vtanh.f32 %v1945_v33 }
 0xc98   : > { %v2634_v34 = vpop.eup %2633 }
 0xc99   : > { %v2636_v35 = vpop.eup %2635  ;;  %v1952_v36 = vadd.f32 1.0, %v2634_v34 }
 0xc9a   : > { %v1950_v37 = vadd.f32 1.0, %v2636_v35 }
 0xc9b   : > { %v2638_v38 = vpop.eup %2637  ;;  %v1955_v59 = vmul.f32 0.5, %v1952_v36 }
 0xc9c   : > { %v1953_v39 = vmul.f32 0.5, %v1950_v37  ;;  %v1951_v53 = vadd.f32 1.0, %v2638_v38 }
 0xc9d   : > { %v1958_v41 = vmul.f32 %v1955_v59, %v1927_v14 }
 0xc9e   : > { %v1954_v40 = vmul.f32 0.5, %v1951_v53  ;;  %v1956_v42 = vmul.f32 %v1953_v39, %v1919_v58 }
 0xc9f   : > { %v1960_v45 = vpack.c.bf16 %v1958_v41, %v1958_v41 }
 0xca0   : > { %v1957_v43 = vmul.f32 %v1954_v40, %v1922_v57 }
 0xca2   : > { %v1959_v44 = vpack.c.bf16 %v1957_v43, %v1956_v42 }
 0xca4   : > { %2466 = vmatprep.mubr.msk.bf16.mxu1 %vm2000_vm9, %v1959_v44 }
 0xca5   : > { %2467 = vmatmul.mubr.msk.bf16.vlgmr.msra.gmra.mrb[32].mxu1 %vm2000_vm9, %v1960_v45 }
 0xd78   : > { %v2468_v51 = vpop.f32.mrb[32].mxu1 }
 0xd79   : > { %v2050_v47 = vadd.f32 %v2468_v51, %v2205_v46  ;;  %v2041_v48 = vpop.f32.mrb[33].mxu1 }
 0xd7a   : > { %v2042_v49 = vadd.f32 %v2205_v46, %v2041_v48  ;;  %v2469_v50 = vpop.f32.mrb[34].mxu1 }
 0xd7b   : > { %v2057_v52 = vadd.f32 %v2050_v47, %v3019_v24  ;;  %v2044_v54 = vpop.f32.mrb[35].mxu1 }
 0xd7c   : > { %v2055_v56 = vadd.f32 %v2042_v49, %v3016_v21  ;;  %v2045_v61 = vadd.f32 %v2205_v46, %v2044_v54 }
 0xd7d   : > { %v2219_v62 = vpack.c.bf16 %v2057_v52, %v2057_v52 }
 0xd7e   : > { %v2217_v63 = vpack.c.bf16 %v2055_v56, %v2055_v56  ;;  %v2056_v0 = vadd.f32 %v2045_v61, %v3021_v25 }
 0xd7f   : > { %v2078_v5 = vsel %vm2076_vm11, %v2219_v62, %v2077_v55 }
 0xd80   : > { %2079 = vst [vmem:[%s440_s28 + $0x8] sm:$0x1] %v2078_v5  ;;  %2072 = vst.msk [vmem:[%s440_s28] sm:$0xf] %vm2071_vm12, %v2217_v63  ;;  %v2218_v60 = vpack.c.bf16 %v2056_v0, %v2056_v0 }
 0xd82   : > { %2073 = vst.msk [vmem:[%s440_s28 + $0x4] sm:$0xf] %vm2071_vm12, %v2218_v60 }
 0xd83 PF: > { %s23_s25 = sadd.s32 1, %s2645_s25  }
 0xd84   : > { %p20_p4 = scmp.ge.s32.totalorder %s23_s25, 4  }
 0xd86   :  { %22 = sbr.rel (!%p20_p4) target bundleno = 1 (0x1), region = 102 }

</bundles_post_ra>
